<compile_context>
chip_gen: v7x
topology: tpu7x:2x2x1
jax: 0.10.0
libtpu: 0.0.40
codegen_flags: <defaults>
</compile_context>

<pallas_src>
import jax
import jax.numpy as jnp
from jax.experimental import pallas as pl
from jax.experimental.pallas import tpu as pltpu

EPS = 1e-8        # CoorsNorm eps (clamp on the norm)
LN_EPS = 1e-5     # nn.LayerNorm default eps (reference only)
GROUP = 128       # coordinate tuples packed per lane-dense row


def coors_norm_kernel(x_ref, seg_ref, bcast_ref, o_ref):
    """x_ref:   (tm, D*128) lane-dense coords
       seg_ref: (D*128, 128) 0/1 segment-sum matrix (lane r -> tuple r//D)
       bcast_ref: (128, D*128) == phase * seg.T (phase pre-folded)
       o_ref:   like x_ref"""
    x = x_ref[...].astype(jnp.float32)                              # (tm, D*128)
    # Per-tuple sum of squares on the (otherwise idle) MXU.
    ss = jnp.dot(x * x, seg_ref[...],
                 preferred_element_type=jnp.float32,
                 precision=jax.lax.Precision.HIGHEST)               # (tm, 128)
    # 1 / clamp(||x||, eps) == rsqrt(max(ss, eps^2))  (ss >= 0) — EUP slot.
    inv = jax.lax.rsqrt(jnp.maximum(ss, EPS * EPS))                 # (tm, 128)
    # Broadcast the per-tuple scale back across the D lanes of each tuple;
    # the GELU(LayerNorm(norm)) phase constant rides along in bcast_ref.
    scale = jnp.dot(inv, bcast_ref[...],
                    preferred_element_type=jnp.float32,
                    precision=jax.lax.Precision.HIGHEST)            # (tm, D*128)
    o_ref[...] = (x * scale).astype(o_ref.dtype)


def _coors_norm_jnp(x, phase):
    """Fused plain-JAX path for tiny inputs / ragged tails (already at roofline)."""
    xf = x.astype(jnp.float32)
    ss = jnp.sum(xf * xf, axis=-1, keepdims=True)
    inv = jax.lax.rsqrt(jnp.maximum(ss, EPS * EPS))
    return (xf * (phase * inv)).astype(x.dtype)


def _sublane_multiple(dtype):
    return max(8, 32 // jnp.dtype(dtype).itemsize)   # 8 f32, 16 bf16, 32 int8/fp8


def _round_up(x, m):
    return ((x + m - 1) // m) * m


def coors_norm(coors, ln_weight, ln_bias, *,
               block_bytes=3 << 20, min_pallas_rows=1 << 16):
    orig_shape = coors.shape
    D = int(orig_shape[-1])
    dtype = coors.dtype
    x = coors.reshape(-1, D)                       # metadata-only reshape
    N = x.shape[0]

    # LayerNorm over a size-1 feature axis is exactly degenerate:
    # (norm - mean) == 0 and var == 0, so LayerNorm(norm) == bias bit-for-bit
    # and phase == GELU(bias) is a constant; the weight provably has no effect.
    del ln_weight
    phase = jax.nn.gelu(ln_bias.astype(jnp.float32).reshape(()), approximate=False)

    G = N // GROUP                                 # full lane-dense groups
    if N < min_pallas_rows or G == 0:
        # Launch + pipeline overhead dwarfs the work at small N; XLA's fusion
        # is already at the HBM roofline there.
        return _coors_norm_jnp(x, phase).reshape(orig_shape)

    LANES = D * GROUP                              # 384 for 3-D coordinates
    n_main = G * GROUP

    # Segment-sum matrix: seg[r, j] == 1 iff lane r belongs to tuple j.
    r = jnp.arange(LANES, dtype=jnp.int32)
    seg = (r[:, None] // D ==
           jnp.arange(GROUP, dtype=jnp.int32)[None, :]).astype(jnp.float32)
    bcast = phase * seg.T                          # (GROUP, LANES), phase folded in

    # Block sizing: ~block_bytes of useful data per buffer (default 3 MiB so
    # in+out double-buffered stays under v5e's 16 MiB scoped-VMEM default;
    # pass 6<<20 on v6e/v7x for the 32 MiB budget), rounded to the dtype
    # sublane multiple, split into >= 2 grid steps when possible so
    # "parallel" can shard the row axis across v7x's two TensorCores.
    itemsize = jnp.dtype(dtype).itemsize
    sub = _sublane_multiple(dtype)
    block_groups = max(sub, (block_bytes // (LANES * itemsize)) // sub * sub)
    if G <= sub:
        tm_g = G                                   # single full-extent block
    elif G < 2 * sub:
        tm_g = sub
    else:
        tm_g = min(block_groups, _round_up(pl.cdiv(G, 2), sub))
    grid = (pl.cdiv(G, tm_g),)

    x_main = x[:n_main].reshape(G, LANES)          # contiguous -> metadata reshape

    cost = pl.CostEstimate(
        flops=4 * n_main * (LANES + D),            # 2 segment-sum matmuls + elementwise
        transcendentals=n_main,                    # one rsqrt per coordinate tuple
        bytes_accessed=2 * n_main * D * itemsize,
    )

    out_main = pl.pallas_call(
        coors_norm_kernel,
        out_shape=jax.ShapeDtypeStruct((G, LANES), dtype),
        grid=grid,
        in_specs=[
            pl.BlockSpec((tm_g, LANES), lambda i: (i, 0)),
            # Constant matrices: same block every step -> fetched once.
            pl.BlockSpec((LANES, GROUP), lambda i: (0, 0)),
            pl.BlockSpec((GROUP, LANES), lambda i: (0, 0)),
        ],
        out_specs=pl.BlockSpec((tm_g, LANES), lambda i: (i, 0)),
        compiler_params=pltpu.CompilerParams(
            dimension_semantics=("parallel",)),
        cost_estimate=cost,
    )(x_main, seg, bcast)

    out_main = out_main.reshape(n_main, D)
    if n_main == N:
        out_flat = out_main
    else:
        # Ragged (<128-row) tail in plain JAX.
        # TODO(synk): the concat costs one extra pass over the main output;
        # callers with huge N should prefer row counts that are multiples of 128.
        out_tail = _coors_norm_jnp(x[n_main:], phase)
        out_flat = jnp.concatenate([out_main, out_tail], axis=0)
    return out_flat.reshape(orig_shape)


def coors_norm_ref(coors, ln_weight, ln_bias):
    """Pure-JAX reference, literal transcription of the PyTorch module."""
    norm = jnp.linalg.norm(coors, axis=-1, keepdims=True)
    normed = coors / jnp.maximum(norm, EPS)
    mean = jnp.mean(norm, axis=-1, keepdims=True)
    var = jnp.mean((norm - mean) ** 2, axis=-1, keepdims=True)
    ln = (norm - mean) * jax.lax.rsqrt(var + LN_EPS) * ln_weight + ln_bias
    phase = jax.nn.gelu(ln, approximate=False)
    return phase * normed


if __name__ == "__main__":
    key = jax.random.PRNGKey(0)
    k_x1, k_x2, k_x3, k_w, k_b = jax.random.split(key, 5)

    # nn.LayerNorm(1) params; random so phase = GELU(bias) is non-trivial.
    ln_weight = jax.random.normal(k_w, (1,), dtype=jnp.float32)
    ln_bias = jax.random.normal(k_b, (1,), dtype=jnp.float32)

    # Case 1: typical tiny CoorsNorm shape (batch=2, seq=8, coord=3) — goes
    # through the small-N fused-jnp fast path.
    x1 = jax.random.normal(k_x1, (2, 8, 3), dtype=jnp.float32)
    out1 = jax.block_until_ready(coors_norm(x1, ln_weight, ln_bias))
    ref1 = coors_norm_ref(x1, ln_weight, ln_bias)
    assert out1.shape == x1.shape and out1.dtype == x1.dtype
    assert jnp.allclose(out1, ref1, atol=1e-5, rtol=1e-5), "mismatch (fast path)"

    # Case 2: force the Pallas kernel with a ragged tail
    # (N = 2*300 = 600 rows -> 4 full 128-row groups + an 88-row jnp tail).
    x2 = jax.random.normal(k_x2, (2, 300, 3), dtype=jnp.float32)
    out2 = jax.block_until_ready(
        coors_norm(x2, ln_weight, ln_bias, min_pallas_rows=0))
    ref2 = coors_norm_ref(x2, ln_weight, ln_bias)
    assert out2.shape == x2.shape and out2.dtype == x2.dtype
    assert jnp.allclose(out2, ref2, atol=1e-5, rtol=1e-5), "mismatch (tail path)"

    # Case 3: multi-block grid with a partial boundary block
    # (N = 4480 rows -> 35 groups -> block of 24 groups -> 2 grid steps).
    x3 = jax.random.normal(k_x3, (4480, 3), dtype=jnp.float32)
    out3 = jax.block_until_ready(
        coors_norm(x3, ln_weight, ln_bias, min_pallas_rows=0))
    ref3 = coors_norm_ref(x3, ln_weight, ln_bias)
    assert out3.shape == x3.shape and out3.dtype == x3.dtype
    assert jnp.allclose(out3, ref3, atol=1e-5, rtol=1e-5), "mismatch (multi-block)"

    print("KERNEL_OK")
</pallas_src>

<mosaic_0001>
module attributes {stable_mosaic.version = 11 : i64} {
  func.func @coors_norm_kernel(%arg0: i32, %arg1: memref<4x384xf32, #tpu.memory_space<vmem>>, %arg2: memref<384x128xf32, #tpu.memory_space<vmem>>, %arg3: memref<128x384xf32, #tpu.memory_space<vmem>>, %arg4: memref<4x384xf32, #tpu.memory_space<vmem>>) attributes {dimension_semantics = [#tpu.dimension_semantics<parallel>], iteration_bounds = array<i64: 1>, scalar_prefetch = 0 : i64, scratch_operands = 0 : i64, tpu.core_type = #tpu.core_type<tc>, window_params = [{transform_indices = @transform_0, window_bounds = array<i64: 4, 384>}, {pipeline_mode = #tpu.pipeline_mode<synchronous>, transform_indices = @transform_1, window_bounds = array<i64: 384, 128>}, {pipeline_mode = #tpu.pipeline_mode<synchronous>, transform_indices = @transform_2, window_bounds = array<i64: 128, 384>}, {transform_indices = @transform_3, window_bounds = array<i64: 4, 384>}]} {
    %c0 = arith.constant 0 : index
    %c0_0 = arith.constant 0 : index
    %0 = vector.load %arg1[%c0, %c0_0] : memref<4x384xf32, #tpu.memory_space<vmem>>, vector<4x384xf32>
    %1 = arith.mulf %0, %0 : vector<4x384xf32>
    %c0_1 = arith.constant 0 : index
    %c0_2 = arith.constant 0 : index
    %2 = vector.load %arg2[%c0_1, %c0_2] : memref<384x128xf32, #tpu.memory_space<vmem>>, vector<384x128xf32>
    %cst = arith.constant dense<0.000000e+00> : vector<4x128xf32>
    %3 = tpu.matmul %1, %2, %cst {dimension_numbers = #tpu.dot_dimension_numbers<[1], [0], [0], [1], [0, 0, 1, 1], [], []>, precision = #tpu.contract_precision<fp32>} : vector<4x384xf32>, vector<384x128xf32>, vector<4x128xf32> -> vector<4x128xf32>
    %cst_3 = arith.constant 1.000000e-16 : f32
    %4 = vector.broadcast %cst_3 : f32 to vector<4x128xf32>
    %5 = arith.maximumf %3, %4 : vector<4x128xf32>
    %6 = math.rsqrt %5 : vector<4x128xf32>
    %c0_4 = arith.constant 0 : index
    %c0_5 = arith.constant 0 : index
    %7 = vector.load %arg3[%c0_4, %c0_5] : memref<128x384xf32, #tpu.memory_space<vmem>>, vector<128x384xf32>
    %cst_6 = arith.constant dense<0.000000e+00> : vector<4x384xf32>
    %8 = tpu.matmul %6, %7, %cst_6 {dimension_numbers = #tpu.dot_dimension_numbers<[1], [0], [0], [1], [0, 0, 1, 1], [], []>, precision = #tpu.contract_precision<fp32>} : vector<4x128xf32>, vector<128x384xf32>, vector<4x384xf32> -> vector<4x384xf32>
    %9 = arith.mulf %0, %8 : vector<4x384xf32>
    %c0_7 = arith.constant 0 : index
    %c0_8 = arith.constant 0 : index
    %10 = vector.load %arg4[%c0_7, %c0_8] : memref<4x384xf32, #tpu.memory_space<vmem>>, vector<4x384xf32>
    tpu.vector_store %arg4[%c0_7, %c0_8], %9 {strides = array<i32>} : memref<4x384xf32, #tpu.memory_space<vmem>>, vector<4x384xf32>,
    return
  }
  func.func @transform_0(%arg0: i32) -> (i32, i32) {
    %c0_i32 = arith.constant 0 : i32
    %c0_i32_0 = arith.constant 0 : i32
    return %arg0, %c0_i32 : i32, i32
  }
  func.func @transform_1(%arg0: i32) -> (i32, i32) {
    %c0_i32 = arith.constant 0 : i32
    %c0_i32_0 = arith.constant 0 : i32
    %c0_i32_1 = arith.constant 0 : i32
    return %c0_i32, %c0_i32_0 : i32, i32
  }
  func.func @transform_2(%arg0: i32) -> (i32, i32) {
    %c0_i32 = arith.constant 0 : i32
    %c0_i32_0 = arith.constant 0 : i32
    %c0_i32_1 = arith.constant 0 : i32
    return %c0_i32, %c0_i32_0 : i32, i32
  }
  func.func @transform_3(%arg0: i32) -> (i32, i32) {
    %c0_i32 = arith.constant 0 : i32
    %c0_i32_0 = arith.constant 0 : i32
    return %arg0, %c0_i32 : i32, i32
  }
}

</mosaic_0001>

<bundles_post_ra>
// kernel: tpu_custom_call.1
= control target key start
LH: loop header
LB: loop body
LE: loop exit
PB: predicated region body
PF: predicated region fallthrough
CT: control target
= control target key end

     0   :  { %8 = vsyncpa [#allocation3], 0  ;;  %s6644_s0 = inlined_call_operand.hbm [shape: f32[4,384], index: 0, kind: input, shape index: {}]   ;;  %s6645_s1 = inlined_call_operand.hbm [shape: f32[384,128], index: 1, kind: input, shape index: {}]   ;;  %s6646_s2 = inlined_call_operand.hbm [shape: f32[128,384], index: 2, kind: input, shape index: {}]   ;;  %s6647_s3 = inlined_call_operand.hbm [shape: f32[4,384], index: 3, kind: output, shape index: {}]  }
   0x1   :  { %9 = vsyncpa [#allocation6], 0 }
   0x2   :  { %10 = vsyncpa [#allocation4], 0  ;;  %s4828_s12 = smov [#allocation5]   ;;  %s4734_s16 = scalar_lea.hbm %s6645_s1, 6144 }
   0x3   :  { %s26_s13 = sshll.u32 %s4828_s12, 4  ;;  %p4735_p0 = scmp.ne.s32.totalorder %s6645_s1, %s4734_s16  ;;  %s27_s13 = int_to_ptr.vmem [resolvable:$true] %s26_s13 }
   0x4   :  { %p4738_p1 = scmp.lt.u32.totalorder %s4734_s16, %s6645_s1 }
   0x6   :  { %p4740_p2 = pnand %p4738_p1, %p4735_p0 }
   0x8   :  { %4743 = shalt.err (!%p4740_p2)
}
   0x9   :  { %s4744_s21 = scalar_lea.vmem %s27_s13, 6144  ;;  %p4749_p4 = scmp.lt.s32.totalorder %s27_s13, %s27_s13 }
   0xa   :  { %p4745_p3 = scmp.ne.s32.totalorder %s27_s13, %s4744_s21  ;;  %p4750_p5 = scmp.lt.s32.totalorder %s4744_s21, %s4744_s21 }
   0xc   :  { %p4751_p6 = por %p4750_p5, %p4749_p4 }
   0xe   :  { %p4752_p7 = pnand %p4751_p6, %p4745_p3 }
  0x10   :  { %4755 = shalt.err (!%p4752_p7)
}
  0x11   :  { %s4829_s22 = smov 128   ;;  %s4830_s23 = smov 8  }
  0x12   :  { %32 = dma.hbm_to_vmem [thread:$0]  %s6645_s1, 6144, %s27_s13, [#allocation6], %s4829_s22, %s4829_s22, %s4830_s23  }
  0x13   :  { %s4831_s26 = smov [#allocation2]   ;;  %s4832_s28 = smov [#allocation7]  }
  0x14   :  { %s17_s27 = sshll.u32 %s4831_s26, 4  ;;  %s38_s29 = sshll.u32 %s4832_s28, 4  ;;  %s18_s27 = int_to_ptr.vmem [resolvable:$true] %s17_s27  ;;  %s39_s29 = int_to_ptr.vmem [resolvable:$true] %s38_s29 }
  0x15   :  { %s4756_s5 = scalar_lea.hbm %s6644_s0, 192 }
  0x16   :  { %p4757_p8 = scmp.ne.s32.totalorder %s6644_s0, %s4756_s5  ;;  %p4760_p9 = scmp.lt.u32.totalorder %s4756_s5, %s6644_s0 }
  0x18   :  { %p4762_p10 = pnand %p4760_p9, %p4757_p8 }
  0x1a   :  { %4765 = shalt.err (!%p4762_p10)
}
  0x1b   :  { %s4766_s1 = scalar_lea.vmem %s18_s27, 192  ;;  %p4771_p12 = scmp.lt.s32.totalorder %s18_s27, %s18_s27 }
  0x1c   :  { %p4767_p11 = scmp.ne.s32.totalorder %s18_s27, %s4766_s1  ;;  %p4772_p13 = scmp.lt.s32.totalorder %s4766_s1, %s4766_s1 }
  0x1e   :  { %p4773_p0 = por %p4772_p13, %p4771_p12 }
  0x20   :  { %p4774_p1 = pnand %p4773_p0, %p4767_p11 }
  0x22   :  { %4777 = shalt.err (!%p4774_p1)
}
  0x23   :  { %20 = dma.hbm_to_vmem [thread:$0]  %s6644_s0, 192, %s18_s27, [#allocation3]  }
  0x24   :  { %s4778_s14 = scalar_lea.hbm %s6646_s2, 6144 }
  0x25   :  { %p4779_p2 = scmp.ne.s32.totalorder %s6646_s2, %s4778_s14  ;;  %p4782_p3 = scmp.lt.u32.totalorder %s4778_s14, %s6646_s2 }
  0x27   :  { %p4784_p4 = pnand %p4782_p3, %p4779_p2 }
  0x29   :  { %4787 = shalt.err (!%p4784_p4)
}
  0x2a   :  { %s4788_s19 = scalar_lea.vmem %s39_s29, 6144  ;;  %p4793_p6 = scmp.lt.s32.totalorder %s39_s29, %s39_s29 }
  0x2b   :  { %p4789_p5 = scmp.ne.s32.totalorder %s39_s29, %s4788_s19  ;;  %p4794_p7 = scmp.lt.s32.totalorder %s4788_s19, %s4788_s19 }
  0x2d   :  { %p4795_p8 = por %p4794_p7, %p4793_p6 }
  0x2f   :  { %p4796_p9 = pnand %p4795_p8, %p4789_p5 }
  0x31   :  { %4799 = shalt.err (!%p4796_p9)
}
  0x32   :  { %s4833_s0 = smov 384   ;;  %s4834_s20 = smov 24  }
  0x33   :  { %44 = dma.hbm_to_vmem [thread:$0]  %s6646_s2, 6144, %s39_s29, [#allocation6], %s4833_s0, %s4833_s0, %s4834_s20  }
  0x34   :  { %4822 = dma.done.wait [#allocation3], 192  }
  0x35   :  { %4823 = vsyncadd [#allocation3], 4294967104 }
  0x36   :  { %4824 = dma.done.wait [#allocation6], 12288  }
  0x37   :  { %4825 = vsyncadd [#allocation6], 4294955008  ;;  %v6654_v0 = vmov 0.0|0.0   ;;  %vm4836_vm0 = vmmov 0   ;;  %v6648_v1 = vmov 0.0   ;;  %v74_v2 = vld [vmem:[#allocation5 + $0x80] sm:$0xff] }
  0x38   :  { %4208 = vmatprep.subr.bf16.mxu0 %v6654_v0  ;;  %3628 = vmatprep.mubr.msk.f32.mxu0 %vm4836_vm0, %v6648_v1  ;;  %v75_v3 = vld [vmem:[#allocation5 + $0x88] sm:$0xff]  ;;  %v90_v4 = vld [vmem:[#allocation5 + $0x100] sm:$0xff]  ;;  %v158_v5 = vand.u32 4294901760, %v74_v2  ;;  %v76_v14 = vld [vmem:[#allocation5 + $0x90] sm:$0xff]  ;;  %s4838_s2 = smov [#allocation8]  }
  0x39   :  { %v161_v6 = vand.u32 4294901760, %v75_v3  ;;  %v91_v7 = vld [vmem:[#allocation5 + $0x108] sm:$0xff]  ;;  %v972_v8 = vand.u32 4294901760, %v90_v4  ;;  %v58_v9 = vld [vmem:[#allocation5] sm:$0xff]  ;;  %v77_v15 = vld [vmem:[#allocation5 + $0x98] sm:$0xff]  ;;  %v164_v30 = vand.u32 4294901760, %v76_v14 }
  0x3a   :  { %v59_v10 = vld [vmem:[#allocation5 + $0x8] sm:$0xff]  ;;  %v975_v11 = vand.u32 4294901760, %v91_v7  ;;  %v110_v12 = vand.u32 4294901760, %v58_v9  ;;  %v92_v16 = vld [vmem:[#allocation5 + $0x110] sm:$0xff]  ;;  %v4900_v18 = vsub.f32 %v74_v2, %v158_v5  ;;  %v93_v21 = vld [vmem:[#allocation5 + $0x118] sm:$0xff]  ;;  %v167_v31 = vand.u32 4294901760, %v77_v15 }
  0x3b   :  { %v113_v13 = vand.u32 4294901760, %v59_v10  ;;  %v4898_v17 = vpack.c.bf16 %v161_v6, %v158_v5  ;;  %v4902_v19 = vsub.f32 %v75_v3, %v161_v6  ;;  %v4904_v20 = vsub.f32 %v90_v4, %v972_v8  ;;  %v60_v22 = vld [vmem:[#allocation5 + $0x10] sm:$0xff]  ;;  %v61_v23 = vld [vmem:[#allocation5 + $0x18] sm:$0xff]  ;;  %v78_v28 = vld [vmem:[#allocation5 + $0xa0] sm:$0xff]  ;;  %s3172_s23 = sshll.u32 %s4838_s2, 4  ;;  %s3173_s23 = int_to_ptr.vmem [resolvable:$true] %s3172_s23 }
  0x3c   :  { %6924 = vst [vmem:[#allocation13_spill] sm:$0xff] %v4900_v18  ;;  %v4906_v24 = vpack.c.bf16 %v975_v11, %v972_v8  ;;  %v4908_v25 = vsub.f32 %v91_v7, %v975_v11  ;;  %v4912_v27 = vsub.f32 %v58_v9, %v110_v12  ;;  %v978_v32 = vand.u32 4294901760, %v92_v16  ;;  %v79_v33 = vld [vmem:[#allocation5 + $0xa8] sm:$0xff]  ;;  %v94_v38 = vld [vmem:[#allocation5 + $0x120] sm:$0xff]  ;;  %v80_v46 = vld [vmem:[#allocation5 + $0xb0] sm:$0xff]  ;;  %s4800_s24 = scalar_lea.vmem %s3173_s23, 192  ;;  %p4805_p11 = scmp.lt.s32.totalorder %s3173_s23, %s3173_s23 }
  0x3d   :  { %6923 = vst [vmem:[#allocation12_spill] sm:$0xff] %v4898_v17  ;;  %6925 = vst [vmem:[#allocation14_spill] sm:$0xff] %v4902_v19  ;;  %v4910_v26 = vpack.c.bf16 %v113_v13, %v110_v12  ;;  %4017 = vmatprep.subr.bf16.mxu1 %v4898_v17  ;;  %v4915_v29 = vsub.f32 %v59_v10, %v113_v13  ;;  %v981_v34 = vand.u32 4294901760, %v93_v21  ;;  %v116_v35 = vand.u32 4294901760, %v60_v22  ;;  %v95_v39 = vld [vmem:[#allocation5 + $0x128] sm:$0xff]  ;;  %v62_v44 = vld [vmem:[#allocation5 + $0x20] sm:$0xff]  ;;  %p4801_p10 = scmp.ne.s32.totalorder %s3173_s23, %s4800_s24  ;;  %p4806_p12 = scmp.lt.s32.totalorder %s4800_s24, %s4800_s24 }
  0x3e   :  { %6926 = vst [vmem:[#allocation15_spill] sm:$0xff] %v4904_v20  ;;  %6927 = vst [vmem:[#allocation16_spill] sm:$0xff] %v4906_v24  ;;  %4210 = vmatpush3.bf16.msra.mxu0 %v4906_v24  ;;  %v119_v36 = vand.u32 4294901760, %v61_v23  ;;  %v170_v37 = vand.u32 4294901760, %v78_v28  ;;  %v4920_v40 = vpack.c.bf16 %v167_v31, %v164_v30  ;;  %v4922_v41 = vsub.f32 %v76_v14, %v164_v30  ;;  %v63_v45 = vld [vmem:[#allocation5 + $0x28] sm:$0xff]  ;;  %v81_v51 = vld [vmem:[#allocation5 + $0xb8] sm:$0xff] }
  0x3f   :  { %6928 = vst [vmem:[#allocation17_spill] sm:$0xff] %v4908_v25  ;;  %6929 = vst [vmem:[#allocation18_spill] sm:$0xff] %v4910_v26  ;;  %4019 = vmatpush3.bf16.msra.mxu1 %v4910_v26  ;;  %4211 = vmatprep.subr.bf16.mxu0 %v6654_v0  ;;  %v4924_v42 = vsub.f32 %v77_v15, %v167_v31  ;;  %v4926_v43 = vsub.f32 %v92_v16, %v978_v32  ;;  %v173_v53 = vand.u32 4294901760, %v79_v33  ;;  %v96_v60 = vld [vmem:[#allocation5 + $0x130] sm:$0xff]  ;;  %v97_v61 = vld [vmem:[#allocation5 + $0x138] sm:$0xff]  ;;  %p4807_p13 = por %p4806_p12, %p4805_p11 }
  0x40   :  { %6930 = vst [vmem:[#allocation19_spill] sm:$0xff] %v4912_v27  ;;  %6931 = vst [vmem:[#allocation20_spill] sm:$0xff] %v4920_v40  ;;  %v4928_v47 = vpack.c.bf16 %v981_v34, %v978_v32  ;;  %v4930_v48 = vsub.f32 %v93_v21, %v981_v34  ;;  %v4932_v49 = vpack.c.bf16 %v119_v36, %v116_v35  ;;  %4021 = vmatprep.subr.bf16.mxu1 %v4920_v40  ;;  %v64_v4 = vld [vmem:[#allocation5 + $0x30] sm:$0xff]  ;;  %v65_v5 = vld [vmem:[#allocation5 + $0x38] sm:$0xff] }
  0x41   :  { %v4934_v50 = vsub.f32 %v60_v22, %v116_v35  ;;  %v4937_v52 = vsub.f32 %v61_v23, %v119_v36  ;;  %v4939_v54 = vsub.f32 %v78_v28, %v170_v37  ;;  %v984_v55 = vand.u32 4294901760, %v94_v38  ;;  %v82_v6 = vld [vmem:[#allocation5 + $0xc0] sm:$0xff]  ;;  %v83_v11 = vld [vmem:[#allocation5 + $0xc8] sm:$0xff]  ;;  %v105_v40 = vld [vmem:[#allocation5 + $0x178] sm:$0xff]  ;;  %p4808_p0 = pnand %p4807_p13, %p4801_p10 }
  0x42   :  { %6932 = vst [vmem:[#allocation21_spill] sm:$0xff] %v4928_v47  ;;  %6933 = vst [vmem:[#allocation22_spill] sm:$0xff] %v4932_v49  ;;  %4213 = vmatpush3.bf16.msra.mxu0 %v4928_v47  ;;  %v987_v56 = vand.u32 4294901760, %v95_v39  ;;  %v122_v57 = vand.u32 4294901760, %v62_v44  ;;  %v125_v58 = vand.u32 4294901760, %v63_v45  ;;  %v176_v59 = vand.u32 4294901760, %v80_v46 }
  0x43   :  { %4023 = vmatpush3.bf16.msra.mxu1 %v4932_v49  ;;  %4214 = vmatprep.subr.bf16.mxu0 %v6654_v0  ;;  %v4944_v62 = vpack.c.bf16 %v173_v53, %v170_v37  ;;  %v4946_v63 = vsub.f32 %v79_v33, %v173_v53  ;;  %v4948_v2 = vsub.f32 %v94_v38, %v984_v55  ;;  %v179_v3 = vand.u32 4294901760, %v81_v51  ;;  %v98_v12 = vld [vmem:[#allocation5 + $0x140] sm:$0xff]  ;;  %v99_v13 = vld [vmem:[#allocation5 + $0x148] sm:$0xff]  ;;  %v88_v47 = vld [vmem:[#allocation5 + $0xf0] sm:$0xff] }
  0x44   :  { %v4950_v7 = vpack.c.bf16 %v987_v56, %v984_v55  ;;  %v4952_v8 = vsub.f32 %v95_v39, %v987_v56  ;;  %v4954_v9 = vpack.c.bf16 %v125_v58, %v122_v57  ;;  %v4956_v10 = vsub.f32 %v62_v44, %v122_v57  ;;  %v66_v35 = vld [vmem:[#allocation5 + $0x40] sm:$0xff]  ;;  %v67_v44 = vld [vmem:[#allocation5 + $0x48] sm:$0xff]  ;;  %v100_v57 = vld [vmem:[#allocation5 + $0x150] sm:$0xff] }
  0x45   :  { %6934 = vst [vmem:[#allocation23_spill] sm:$0xff] %v4944_v62  ;;  %4025 = vmatprep.subr.bf16.mxu1 %v4944_v62  ;;  %v4959_v14 = vsub.f32 %v63_v45, %v125_v58  ;;  %v4961_v15 = vpack.c.bf16 %v179_v3, %v176_v59  ;;  %v4963_v16 = vsub.f32 %v80_v46, %v176_v59  ;;  %v990_v22 = vand.u32 4294901760, %v96_v60  ;;  %v84_v45 = vld [vmem:[#allocation5 + $0xd0] sm:$0xff]  ;;  %v85_v46 = vld [vmem:[#allocation5 + $0xd8] sm:$0xff]  ;;  %v86_v1 = vld [vmem:[#allocation5 + $0xe0] sm:$0xff] }
  0x46   :  { %6935 = vst [vmem:[#allocation24_spill] sm:$0xff] %v4950_v7  ;;  %6936 = vst [vmem:[#allocation25_spill] sm:$0xff] %v4954_v9  ;;  %v4965_v21 = vsub.f32 %v81_v51, %v179_v3  ;;  %4216 = vmatpush3.bf16.msra.mxu0 %v4950_v7  ;;  %v993_v23 = vand.u32 4294901760, %v97_v61  ;;  %v128_v28 = vand.u32 4294901760, %v64_v4  ;;  %v131_v30 = vand.u32 4294901760, %v65_v5  ;;  %v101_v58 = vld [vmem:[#allocation5 + $0x158] sm:$0xff] }
  0x47   :  { %6937 = vst [vmem:[#allocation26_spill] sm:$0xff] %v4961_v15  ;;  %4027 = vmatpush3.bf16.msra.mxu1 %v4954_v9  ;;  %4217 = vmatprep.subr.bf16.mxu0 %v6654_v0  ;;  %v182_v31 = vand.u32 4294901760, %v82_v6  ;;  %v185_v32 = vand.u32 4294901760, %v83_v11  ;;  %v996_v33 = vand.u32 4294901760, %v98_v12  ;;  %v999_v34 = vand.u32 4294901760, %v99_v13  ;;  %v68_v59 = vld [vmem:[#allocation5 + $0x50] sm:$0xff] }
  0x48   :  { %4029 = vmatprep.subr.bf16.mxu1 %v4961_v15  ;;  %v4971_v36 = vpack.c.bf16 %v993_v23, %v990_v22  ;;  %v4973_v37 = vsub.f32 %v96_v60, %v990_v22  ;;  %v4975_v38 = vsub.f32 %v97_v61, %v993_v23  ;;  %v4977_v39 = vpack.c.bf16 %v131_v30, %v128_v28  ;;  %v71_v15 = vld [vmem:[#allocation5 + $0x68] sm:$0xff]  ;;  %v72_v26 = vld [vmem:[#allocation5 + $0x70] sm:$0xff] }
  0x49   :  { %v4979_v51 = vsub.f32 %v64_v4, %v128_v28  ;;  %v4981_v53 = vsub.f32 %v65_v5, %v131_v30  ;;  %v4983_v55 = vpack.c.bf16 %v185_v32, %v182_v31  ;;  %v4985_v56 = vsub.f32 %v82_v6, %v182_v31  ;;  %v69_v28 = vld [vmem:[#allocation5 + $0x58] sm:$0xff] }
  0x4a   :  { %6938 = vst [vmem:[#allocation27_spill] sm:$0xff] %v4971_v36  ;;  %6939 = vst [vmem:[#allocation28_spill] sm:$0xff] %v4977_v39  ;;  %4219 = vmatpush3.bf16.msra.mxu0 %v4971_v36  ;;  %v4989_v60 = vsub.f32 %v83_v11, %v185_v32  ;;  %v4991_v61 = vpack.c.bf16 %v999_v34, %v996_v33  ;;  %v4993_v3 = vsub.f32 %v98_v12, %v996_v33  ;;  %v102_v12 = vld [vmem:[#allocation5 + $0x160] sm:$0xff] }
  0x4b   :  { %6940 = vst [vmem:[#allocation29_spill] sm:$0xff] %v4983_v55  ;;  %4031 = vmatpush3.bf16.msra.mxu1 %v4977_v39  ;;  %v134_v4 = vand.u32 4294901760, %v66_v35  ;;  %4220 = vmatprep.subr.bf16.mxu0 %v6654_v0  ;;  %v4997_v5 = vsub.f32 %v99_v13, %v999_v34  ;;  %v137_v6 = vand.u32 4294901760, %v67_v44  ;;  %v188_v22 = vand.u32 4294901760, %v84_v45  ;;  %v87_v39 = vld [vmem:[#allocation5 + $0xe8] sm:$0xff] }
  0x4c   :  { %6941 = vst [vmem:[#allocation30_spill] sm:$0xff] %v4991_v61  ;;  %4033 = vmatprep.subr.bf16.mxu1 %v4983_v55  ;;  %v191_v23 = vand.u32 4294901760, %v85_v46  ;;  %v1002_v31 = vand.u32 4294901760, %v100_v57  ;;  %v1005_v11 = vand.u32 4294901760, %v101_v58  ;;  %v140_v32 = vand.u32 4294901760, %v68_v59  ;;  %v103_v34 = vld [vmem:[#allocation5 + $0x168] sm:$0xff] }
  0x4d   :  { %v4999_v30 = vsub.f32 %v66_v35, %v134_v4  ;;  %v5001_v33 = vpack.c.bf16 %v137_v6, %v134_v4  ;;  %v5003_v36 = vsub.f32 %v67_v44, %v137_v6  ;;  %v5007_v13 = vsub.f32 %v84_v45, %v188_v22  ;;  %v70_v55 = vld [vmem:[#allocation5 + $0x60] sm:$0xff] }
  0x4e   :  { %v5005_v0 = vpack.c.bf16 %v191_v23, %v188_v22  ;;  %4222 = vmatpush3.bf16.msra.mxu0 %v4991_v61  ;;  %v5010_v35 = vsub.f32 %v85_v46, %v191_v23  ;;  %v5012_v9 = vpack.c.bf16 %v1005_v11, %v1002_v31  ;;  %v5014_v7 = vsub.f32 %v100_v57, %v1002_v31  ;;  %v89_v57 = vld [vmem:[#allocation5 + $0xf8] sm:$0xff] }
  0x4f   :  { %6942 = vst [vmem:[#allocation31_spill] sm:$0xff] %v5001_v33  ;;  %v5016_v62 = vsub.f32 %v101_v58, %v1005_v11  ;;  %4035 = vmatpush3.bf16.msra.mxu1 %v5001_v33  ;;  %v6945_v44 = vmov 0.0|0.0   ;;  %v143_v4 = vand.u32 4294901760, %v69_v28  ;;  %v5020_v45 = vsub.f32 %v68_v59, %v140_v32  ;;  %v104_v59 = vld [vmem:[#allocation5 + $0x170] sm:$0xff] }
  0x50   :  { %6943 = vst [vmem:[#allocation32_spill] sm:$0xff] %v5005_v0  ;;  %6944 = vst [vmem:[#allocation33_spill] sm:$0xff] %v5012_v9  ;;  %4223 = vmatprep.subr.bf16.mxu0 %v6945_v44  ;;  %v194_v6 = vand.u32 4294901760, %v86_v1  ;;  %v197_v22 = vand.u32 4294901760, %v87_v39  ;;  %4037 = vmatprep.subr.bf16.mxu1 %v5005_v0  ;;  %v1008_v61 = vand.u32 4294901760, %v102_v12  ;;  %v1011_v46 = vand.u32 4294901760, %v103_v34 }
  0x51   :  { %6946 = vst [vmem:[#allocation34_spill] sm:$0xff] %v5020_v45  ;;  %v146_v23 = vand.u32 4294901760, %v70_v55  ;;  %v149_v49 = vand.u32 4294901760, %v71_v15  ;;  %v5023_v31 = vpack.c.bf16 %v143_v4, %v140_v32  ;;  %v5025_v58 = vsub.f32 %v69_v28, %v143_v4  ;;  %v73_v32 = vld [vmem:[#allocation5 + $0x78] sm:$0xff] }
  0x52   :  { %v5027_v11 = vpack.c.bf16 %v197_v22, %v194_v6  ;;  %v5029_v33 = vsub.f32 %v86_v1, %v194_v6  ;;  %4225 = vmatpush3.bf16.msra.mxu0 %v5012_v9  ;;  %v5032_v0 = vsub.f32 %v87_v39, %v197_v22  ;;  %v5034_v24 = vpack.c.bf16 %v1011_v46, %v1008_v61  ;;  %v54_v28 = vld [vmem:[#allocation2] sm:$0xff] }
  0x53   :  { %6947 = vst [vmem:[#allocation35_spill] sm:$0xff] %v5023_v31  ;;  %v5036_v17 = vsub.f32 %v102_v12, %v1008_v61  ;;  %v5038_v45 = vsub.f32 %v103_v34, %v1011_v46  ;;  %4039 = vmatpush3.bf16.msra.mxu1 %v5023_v31  ;;  %4226 = vmatprep.subr.bf16.mxu0 %v6945_v44  ;;  %v200_v39 = vand.u32 4294901760, %v88_v47  ;;  %v203_v22 = vand.u32 4294901760, %v89_v57 }
  0x54   :  { %6948 = vst [vmem:[#allocation36_spill] sm:$0xff] %v5027_v11  ;;  %6949 = vst [vmem:[#allocation37_spill] sm:$0xff] %v5034_v24  ;;  %v5042_v1 = vpack.c.bf16 %v149_v49, %v146_v23  ;;  %v5044_v4 = vsub.f32 %v70_v55, %v146_v23  ;;  %v5046_v6 = vsub.f32 %v71_v15, %v149_v49  ;;  %4041 = vmatprep.subr.bf16.mxu1 %v5027_v11  ;;  %v55_v23 = vld [vmem:[#allocation2 + $0x8] sm:$0xf] }
  0x55   :  { %6950 = vst [vmem:[#allocation38_spill] sm:$0xff] %v5036_v17  ;;  %6951 = vst [vmem:[#allocation39_spill] sm:$0xff] %v5038_v45  ;;  %v1014_v61 = vand.u32 4294901760, %v104_v59  ;;  %v1017_v12 = vand.u32 4294901760, %v105_v40  ;;  %v152_v34 = vand.u32 4294901760, %v72_v26  ;;  %v5049_v46 = vsub.f32 %v88_v47, %v200_v39 }
  0x56   :  { %6952 = vst [vmem:[#allocation40_spill] sm:$0xff] %v5042_v1  ;;  %v155_v9 = vand.u32 4294901760, %v73_v32  ;;  %v56_v45 = vmul.f32 %v54_v28, %v54_v28  ;;  %4228 = vmatpush3.bf16.msra.mxu0 %v5034_v24  ;;  %v5053_v17 = vpack.c.bf16 %v203_v22, %v200_v39  ;;  %v5055_v55 = vsub.f32 %v89_v57, %v203_v22 }
  0x57   :  { %6953 = vst [vmem:[#allocation41_spill] sm:$0xff] %v5049_v46  ;;  %v5057_v49 = vpack.c.bf16 %v1017_v12, %v1014_v61  ;;  %v5059_v15 = vsub.f32 %v104_v59, %v1014_v61  ;;  %4043 = vmatpush3.bf16.msra.mxu1 %v5042_v1  ;;  %4229 = vmatprep.subr.bf16.mxu0 %v6945_v44  ;;  %v6962_v59 = vand.u32 4294901760, %v4900_v18  ;;  %v6697_v61 = vand.u32 4294901760, %v4902_v19 }
  0x58   :  { %6954 = vst [vmem:[#allocation42_spill] sm:$0xff] %v5053_v17  ;;  %6955 = vst [vmem:[#allocation43_spill] sm:$0xff] %v5055_v55  ;;  %v5063_v47 = vsub.f32 %v105_v40, %v1017_v12  ;;  %v5065_v28 = vpack.c.bf16 %v155_v9, %v152_v34  ;;  %v5067_v31 = vsub.f32 %v72_v26, %v152_v34  ;;  %v5069_v24 = vand.u32 4294901760, %v56_v45 }
  0x59   :  { %6956 = vst [vmem:[#allocation44_spill] sm:$0xff] %v5057_v49  ;;  %6957 = vst [vmem:[#allocation45_spill] sm:$0xff] %v5059_v15  ;;  %4045 = vmatprep.subr.bf16.mxu1 %v5053_v17  ;;  %v5072_v57 = vsub.f32 %v73_v32, %v155_v9  ;;  %v107_v39 = vcombine.high %v56_v45, %v56_v45  ;;  %v337_v22 = vsub.f32 %v4900_v18, %v6962_v59 }
  0x5a   :  { %6958 = vst [vmem:[#allocation46_spill] sm:$0xff] %v5063_v47  ;;  %6959 = vst [vmem:[#allocation47_spill] sm:$0xff] %v5065_v28  ;;  %v5079_v40 = vsub.f32 %v56_v45, %v5069_v24  ;;  %v57_v12 = vmul.f32 %v55_v23, %v55_v23  ;;  %v6706_v26 = vand.u32 4294901760, %v4904_v20  ;;  %4231 = vmatpush3.bf16.msra.mxu0 %v5057_v49  ;;  %v6721_v45 = vand.u32 4294901760, %v4915_v29 }
  0x5b   :  { %6960 = vst [vmem:[#allocation48_spill] sm:$0xff] %v5069_v24  ;;  %6961 = vst [vmem:[#allocation49_spill] sm:$0xff] %v5072_v57  ;;  %v5084_v17 = vand.u32 4294901760, %v107_v39  ;;  %v338_v9 = vand.u32 4294901760, %v337_v22  ;;  %v344_v32 = vsub.f32 %v4902_v19, %v6697_v61  ;;  %4047 = vmatpush3.bf16.msra.mxu1 %v5065_v28  ;;  %4232 = vmatprep.subr.bf16.mxu0 %v6945_v44  ;;  %v6966_v22 = vand.u32 4294901760, %v4908_v25 }
  0x5c   :  { %6963 = vst [vmem:[#allocation50_spill] sm:$0xff] %v5079_v40  ;;  %v5093_v23 = vand.u32 4294901760, %v57_v12  ;;  %v1066_v34 = vsub.f32 %v4904_v20, %v6706_v26  ;;  %v6967_v28 = vand.u32 4294901760, %v4912_v27  ;;  %v6968_v11 = vand.u32 4294901760, %v5079_v40 }
  0x5d   :  { %6964 = vst [vmem:[#allocation51_spill] sm:$0xff] %v5084_v17  ;;  %v1073_v49 = vsub.f32 %v4908_v25, %v6966_v22  ;;  %v5102_v61 = vsub.f32 %v107_v39, %v5084_v17  ;;  %v345_v59 = vand.u32 4294901760, %v344_v32  ;;  %v232_v32 = vsub.f32 %v4915_v29, %v6721_v45 }
  0x5e   :  { %6965 = vst [vmem:[#allocation52_spill] sm:$0xff] %v5093_v23  ;;  %v225_v1 = vsub.f32 %v4912_v27, %v6967_v28  ;;  %v214_v24 = vsub.f32 %v5079_v40, %v6968_v11  ;;  %v5112_v26 = vsub.f32 %v57_v12, %v5093_v23  ;;  %v1067_v20 = vand.u32 4294901760, %v1066_v34 }
  0x5f   :  { %v1074_v19 = vand.u32 4294901760, %v1073_v49  ;;  %v6718_v22 = vand.u32 4294901760, %v5102_v61  ;;  %v4048_v39 = vpack.c.bf16 %v345_v59, %v338_v9  ;;  %v6720_v57 = vand.u32 4294901760, %v4922_v41 }
  0x60   :  { %6969 = vst [vmem:[#allocation53_spill] sm:$0xff] %v5112_v26  ;;  %v226_v25 = vand.u32 4294901760, %v225_v1  ;;  %v215_v28 = vand.u32 4294901760, %v214_v24  ;;  %v6719_v27 = vand.u32 4294901760, %v5112_v26  ;;  %v233_v49 = vand.u32 4294901760, %v232_v32 }
  0x61   :  { %v4233_v18 = vpack.c.bf16 %v1074_v19, %v1067_v20  ;;  %v208_v11 = vsub.f32 %v5102_v61, %v6718_v22  ;;  %4049 = vmatprep.subr.bf16.mxu1 %v4048_v39  ;;  %v6722_v12 = vand.u32 4294901760, %v4924_v42  ;;  %v6723_v1 = vand.u32 4294901760, %v4926_v43 }
  0x62   :  { %v1055_v34 = vsub.f32 %v5112_v26, %v6719_v27  ;;  %v351_v19 = vsub.f32 %v4922_v41, %v6720_v57  ;;  %v6726_v20 = vand.u32 4294901760, %v4930_v48  ;;  %v6740_v24 = vand.u32 4294901760, %v4934_v50 }
  0x63   :  { %v209_v9 = vand.u32 4294901760, %v208_v11  ;;  %v4050_v59 = vpack.c.bf16 %v233_v49, %v226_v25  ;;  %v358_v39 = vsub.f32 %v4924_v42, %v6722_v12  ;;  %v1080_v32 = vsub.f32 %v4926_v43, %v6723_v1 }
  0x64   :  { %v1056_v22 = vand.u32 4294901760, %v1055_v34  ;;  %v352_v27 = vand.u32 4294901760, %v351_v19  ;;  %v1087_v57 = vsub.f32 %v4930_v48, %v6726_v20  ;;  %v239_v45 = vsub.f32 %v4934_v50, %v6740_v24 }
  0x65   :  { %210 = vmatprep.mubr.f32.mxu1 %v209_v9  ;;  %v359_v25 = vand.u32 4294901760, %v358_v39  ;;  %v1081_v11 = vand.u32 4294901760, %v1080_v32  ;;  %v6731_v49 = vand.u32 4294901760, %v4937_v52  ;;  %v6729_v12 = vand.u32 4294901760, %v4939_v54 }
  0x66   :  { %216 = vmatmul.mubr.f32.vlgmr.msra.gmra.mrb[0].mxu1 %v215_v28  ;;  %3629 = vmatmul.mubr.f32.vlgmr.msra.gmra.mrb[0].mxu0 %v1056_v22  ;;  %v1088_v1 = vand.u32 4294901760, %v1087_v57  ;;  %v240_v34 = vand.u32 4294901760, %v239_v45  ;;  %v6727_v19 = vand.u32 4294901760, %v4946_v63  ;;  %v6728_v40 = vand.u32 4294901760, %v4948_v2 }
  0x67   :  { %4234 = vmatpush3.bf16.msra.mxu0 %v4233_v18  ;;  %4051 = vmatpush3.bf16.msra.mxu1 %v4050_v59  ;;  %v4052_v20 = vpack.c.bf16 %v359_v25, %v352_v27  ;;  %v246_v9 = vsub.f32 %v4937_v52, %v6731_v49  ;;  %v365_v39 = vsub.f32 %v4939_v54, %v6729_v12  ;;  %v6730_v28 = vand.u32 4294901760, %v4952_v8 }
  0x68   :  { %4235 = vmatprep.subr.bf16.mxu0 %v6945_v44  ;;  %v4236_v57 = vpack.c.bf16 %v1088_v1, %v1081_v11  ;;  %v372_v45 = vsub.f32 %v4946_v63, %v6727_v19  ;;  %v1094_v18 = vsub.f32 %v4948_v2, %v6728_v40  ;;  %v6732_v27 = vand.u32 4294901760, %v4956_v10  ;;  %446 = vmatprep.mubr.f32.mxu1 %v5084_v17 }
  0x69   :  { %4053 = vmatprep.subr.bf16.mxu1 %v4052_v20  ;;  %v247_v22 = vand.u32 4294901760, %v246_v9  ;;  %v366_v59 = vand.u32 4294901760, %v365_v39  ;;  %v1101_v32 = vsub.f32 %v4952_v8, %v6730_v28  ;;  %v6733_v1 = vand.u32 4294901760, %v4959_v14 }
  0x6a   :  { %v6970_v25 = vmov 0.0   ;;  %v373_v11 = vand.u32 4294901760, %v372_v45  ;;  %v1095_v19 = vand.u32 4294901760, %v1094_v18  ;;  %v253_v40 = vsub.f32 %v4956_v10, %v6732_v27 }
  0x6b   :  { %3663 = vmatprep.mubr.msk.f32.mxu0 %vm4836_vm0, %v6970_v25  ;;  %v6738_v12 = vand.u32 4294901760, %v4963_v16  ;;  %4237 = vmatpush3.bf16.msra.mxu0 %v4236_v57  ;;  %v4054_v20 = vpack.c.bf16 %v247_v22, %v240_v34  ;;  %v1102_v9 = vand.u32 4294901760, %v1101_v32  ;;  %v260_v39 = vsub.f32 %v4959_v14, %v6733_v1 }
  0x6c   :  { %v6736_v28 = vand.u32 4294901760, %v4965_v21  ;;  %4238 = vmatprep.subr.bf16.mxu0 %v6945_v44  ;;  %v4056_v49 = vpack.c.bf16 %v373_v11, %v366_v59  ;;  %v254_v45 = vand.u32 4294901760, %v253_v40  ;;  %v6734_v27 = vand.u32 4294901760, %v4973_v37 }
  0x6d   :  { %v379_v18 = vsub.f32 %v4963_v16, %v6738_v12  ;;  %4055 = vmatpush3.bf16.msra.mxu1 %v4054_v20  ;;  %v4239_v57 = vpack.c.bf16 %v1102_v9, %v1095_v19  ;;  %v261_v34 = vand.u32 4294901760, %v260_v39  ;;  %v6735_v32 = vand.u32 4294901760, %v4975_v38 }
  0x6e   :  { %v386_v22 = vsub.f32 %v4965_v21, %v6736_v28  ;;  %4057 = vmatprep.subr.bf16.mxu1 %v4056_v49  ;;  %v1108_v40 = vsub.f32 %v4973_v37, %v6734_v27  ;;  %v6737_v59 = vand.u32 4294901760, %v4979_v51  ;;  %v6739_v11 = vand.u32 4294901760, %v4981_v53 }
  0x6f   :  { %v380_v1 = vand.u32 4294901760, %v379_v18  ;;  %4240 = vmatpush3.bf16.msra.mxu0 %v4239_v57  ;;  %v4058_v20 = vpack.c.bf16 %v261_v34, %v254_v45  ;;  %v1115_v9 = vsub.f32 %v4975_v38, %v6735_v32  ;;  %v6747_v39 = vand.u32 4294901760, %v4985_v56 }
  0x70   :  { %v387_v19 = vand.u32 4294901760, %v386_v22  ;;  %4241 = vmatprep.subr.bf16.mxu0 %v6945_v44  ;;  %v1109_v49 = vand.u32 4294901760, %v1108_v40  ;;  %v267_v18 = vsub.f32 %v4979_v51, %v6737_v59  ;;  %v274_v27 = vsub.f32 %v4981_v53, %v6739_v11 }
  0x71   :  { %v6741_v45 = vand.u32 4294901760, %v4989_v60  ;;  %4059 = vmatpush3.bf16.msra.mxu1 %v4058_v20  ;;  %v1116_v34 = vand.u32 4294901760, %v1115_v9  ;;  %v393_v22 = vsub.f32 %v4985_v56, %v6747_v39  ;;  %v6745_v32 = vand.u32 4294901760, %v4993_v3 }
  0x72   :  { %v4060_v57 = vpack.c.bf16 %v387_v19, %v380_v1  ;;  %v268_v40 = vand.u32 4294901760, %v267_v18  ;;  %v275_v28 = vand.u32 4294901760, %v274_v27  ;;  %v6744_v12 = vand.u32 4294901760, %v4997_v5 }
  0x73   :  { %v400_v59 = vsub.f32 %v4989_v60, %v6741_v45  ;;  %v4242_v11 = vpack.c.bf16 %v1116_v34, %v1109_v49  ;;  %v394_v24 = vand.u32 4294901760, %v393_v22  ;;  %v1122_v1 = vsub.f32 %v4993_v3, %v6745_v32 }
  0x74   :  { %4061 = vmatprep.subr.bf16.mxu1 %v4060_v57  ;;  %v6742_v20 = vand.u32 4294901760, %v4999_v30  ;;  %v4062_v19 = vpack.c.bf16 %v275_v28, %v268_v40  ;;  %v1129_v27 = vsub.f32 %v4997_v5, %v6744_v12  ;;  %v6743_v18 = vand.u32 4294901760, %v5003_v36 }
  0x75   :  { %v401_v9 = vand.u32 4294901760, %v400_v59  ;;  %4243 = vmatpush3.bf16.msra.mxu0 %v4242_v11  ;;  %v1123_v45 = vand.u32 4294901760, %v1122_v1  ;;  %v6746_v57 = vand.u32 4294901760, %v5007_v13  ;;  %v6748_v34 = vand.u32 4294901760, %v5010_v35 }
  0x76   :  { %v281_v49 = vsub.f32 %v4999_v30, %v6742_v20  ;;  %4063 = vmatpush3.bf16.msra.mxu1 %v4062_v19  ;;  %4244 = vmatprep.subr.bf16.mxu0 %v6945_v44  ;;  %v1130_v59 = vand.u32 4294901760, %v1129_v27  ;;  %v288_v22 = vsub.f32 %v5003_v36, %v6743_v18  ;;  %v6753_v11 = vand.u32 4294901760, %v5014_v7  ;;  %v6971_v18 = vld [vmem:[#allocation34_spill] sm:$0xff] }
  0x77   :  { %v4064_v28 = vpack.c.bf16 %v401_v9, %v394_v24  ;;  %v407_v1 = vsub.f32 %v5007_v13, %v6746_v57  ;;  %v414_v20 = vsub.f32 %v5010_v35, %v6748_v34  ;;  %v6752_v19 = vand.u32 4294901760, %v5016_v62 }
  0x78   :  { %v282_v40 = vand.u32 4294901760, %v281_v49  ;;  %v4245_v24 = vpack.c.bf16 %v1130_v59, %v1123_v45  ;;  %v289_v9 = vand.u32 4294901760, %v288_v22  ;;  %v1136_v27 = vsub.f32 %v5014_v7, %v6753_v11 }
  0x79   :  { %4065 = vmatprep.subr.bf16.mxu1 %v4064_v28  ;;  %v6751_v12 = vand.u32 4294901760, %v6971_v18  ;;  %v408_v49 = vand.u32 4294901760, %v407_v1  ;;  %v415_v32 = vand.u32 4294901760, %v414_v20  ;;  %v1143_v57 = vsub.f32 %v5016_v62, %v6752_v19 }
  0x7a   :  { %v6754_v39 = vand.u32 4294901760, %v5025_v58  ;;  %4246 = vmatpush3.bf16.msra.mxu0 %v4245_v24  ;;  %v4066_v34 = vpack.c.bf16 %v289_v9, %v282_v40  ;;  %v1137_v17 = vand.u32 4294901760, %v1136_v27  ;;  %v6755_v28 = vand.u32 4294901760, %v5029_v33  ;;  %v6972_v9 = vld [vmem:[#allocation38_spill] sm:$0xff] }
  0x7b   :  { %v295_v45 = vsub.f32 %v6971_v18, %v6751_v12  ;;  %4247 = vmatprep.subr.bf16.mxu0 %v6945_v44  ;;  %v4068_v59 = vpack.c.bf16 %v415_v32, %v408_v49  ;;  %v1144_v22 = vand.u32 4294901760, %v1143_v57  ;;  %v6756_v1 = vand.u32 4294901760, %v5032_v0  ;;  %v6973_v12 = vld [vmem:[#allocation39_spill] sm:$0xff] }
  0x7c   :  { %v302_v20 = vsub.f32 %v5025_v58, %v6754_v39  ;;  %4067 = vmatpush3.bf16.msra.mxu1 %v4066_v34  ;;  %v421_v40 = vsub.f32 %v5029_v33, %v6755_v28  ;;  %v6757_v27 = vand.u32 4294901760, %v6972_v9  ;;  %v6758_v19 = vand.u32 4294901760, %v6973_v12 }
  0x7d   :  { %v296_v24 = vand.u32 4294901760, %v295_v45  ;;  %4069 = vmatprep.subr.bf16.mxu1 %v4068_v59  ;;  %v4248_v11 = vpack.c.bf16 %v1144_v22, %v1137_v17  ;;  %v428_v57 = vsub.f32 %v5032_v0, %v6756_v1  ;;  %v6759_v49 = vand.u32 4294901760, %v5044_v4 }
  0x7e   :  { %v303_v32 = vand.u32 4294901760, %v302_v20  ;;  %v422_v39 = vand.u32 4294901760, %v421_v40  ;;  %v1150_v34 = vsub.f32 %v6972_v9, %v6757_v27  ;;  %v1157_v45 = vsub.f32 %v6973_v12, %v6758_v19 }
  0x7f   :  { %v6762_v28 = vand.u32 4294901760, %v5046_v6  ;;  %4249 = vmatpush3.bf16.msra.mxu0 %v4248_v11  ;;  %v429_v59 = vand.u32 4294901760, %v428_v57  ;;  %v309_v22 = vsub.f32 %v5044_v4, %v6759_v49  ;;  %v6763_v20 = vand.u32 4294901760, %v5049_v46 }
  0x80   :  { %v4070_v17 = vpack.c.bf16 %v303_v32, %v296_v24  ;;  %4250 = vmatprep.subr.bf16.mxu0 %v6945_v44  ;;  %v1151_v40 = vand.u32 4294901760, %v1150_v34  ;;  %v1158_v1 = vand.u32 4294901760, %v1157_v45  ;;  %v6765_v19 = vand.u32 4294901760, %v5055_v55 }
  0x81   :  { %v316_v27 = vsub.f32 %v5046_v6, %v6762_v28  ;;  %v4072_v11 = vpack.c.bf16 %v429_v59, %v422_v39  ;;  %v310_v24 = vand.u32 4294901760, %v309_v22  ;;  %v435_v32 = vsub.f32 %v5049_v46, %v6763_v20  ;;  %v6974_v59 = vld [vmem:[#allocation49_spill] sm:$0xff] }
  0x82   :  { %4071 = vmatpush3.bf16.msra.mxu1 %v4070_v17  ;;  %v6764_v57 = vand.u32 4294901760, %v5059_v15  ;;  %v4251_v49 = vpack.c.bf16 %v1158_v1, %v1151_v40  ;;  %v442_v34 = vsub.f32 %v5055_v55, %v6765_v19  ;;  %v6766_v45 = vand.u32 4294901760, %v5063_v47  ;;  %v6975_v19 = vld [vmem:[#allocation13_spill] sm:$0xff] }
  0x83   :  { %v317_v26 = vand.u32 4294901760, %v316_v27  ;;  %4073 = vmatprep.subr.bf16.mxu1 %v4072_v11  ;;  %v436_v28 = vand.u32 4294901760, %v435_v32  ;;  %v6775_v17 = vand.u32 4294901760, %v5067_v31  ;;  %v6776_v22 = vand.u32 4294901760, %v6974_v59  ;;  %v6978_v55 = vld [vmem:[#allocation17_spill] sm:$0xff] }
  0x84   :  { %v1164_v39 = vsub.f32 %v5059_v15, %v6764_v57  ;;  %4252 = vmatpush3.bf16.msra.mxu0 %v4251_v49  ;;  %v443_v1 = vand.u32 4294901760, %v442_v34  ;;  %v1171_v27 = vsub.f32 %v5063_v47, %v6766_v45  ;;  %v6976_v45 = vld [vmem:[#allocation14_spill] sm:$0xff] }
  0x85   :  { %v4074_v20 = vpack.c.bf16 %v317_v26, %v310_v24  ;;  %4253 = vmatprep.subr.bf16.mxu0 %v6945_v44  ;;  %v323_v11 = vsub.f32 %v5067_v31, %v6775_v17  ;;  %v330_v32 = vsub.f32 %v6974_v59, %v6776_v22  ;;  %v4080_v47 = vpack.c.bf16 %v6976_v45, %v6975_v19  ;;  %v6979_v17 = vld [vmem:[#allocation19_spill] sm:$0xff]  ;;  %v6986_v59 = vld [vmem:[#allocation48_spill] sm:$0xff] }
  0x86   :  { %v1165_v40 = vand.u32 4294901760, %v1164_v39  ;;  %v4076_v57 = vpack.c.bf16 %v443_v1, %v436_v28  ;;  %v1172_v49 = vand.u32 4294901760, %v1171_v27  ;;  %v6977_v39 = vld [vmem:[#allocation15_spill] sm:$0xff]  ;;  %v4084_v28 = vpack.c.bf16 %v4924_v42, %v4922_v41 }
  0x87   :  { %4075 = vmatpush3.bf16.msra.mxu1 %v4074_v20  ;;  %v324_v26 = vand.u32 4294901760, %v323_v11  ;;  %v331_v24 = vand.u32 4294901760, %v330_v32  ;;  %v4257_v46 = vpack.c.bf16 %v6978_v55, %v6977_v39  ;;  %v4082_v20 = vpack.c.bf16 %v4915_v29, %v6979_v17 }
  0x88   :  { %4077 = vmatprep.subr.bf16.mxu1 %v4076_v57  ;;  %v4254_v34 = vpack.c.bf16 %v1172_v49, %v1165_v40  ;;  %v4260_v57 = vpack.c.bf16 %v4930_v48, %v4926_v43  ;;  %v4086_v1 = vpack.c.bf16 %v4937_v52, %v4934_v50  ;;  %v4088_v27 = vpack.c.bf16 %v4946_v63, %v4939_v54 }
  0x89   :  { %v4078_v15 = vpack.c.bf16 %v331_v24, %v324_v26  ;;  %v4090_v40 = vpack.c.bf16 %v4959_v14, %v4956_v10  ;;  %v6980_v11 = vand.u32 4294901760, %v6975_v19  ;;  %v6982_v49 = vand.u32 4294901760, %v6977_v39 }
  0x8a   :  { %4255 = vmatpush3.bf16.msra.mxu0 %v4254_v34  ;;  %v6983_v26 = vand.u32 4294901760, %v6978_v55  ;;  %v6984_v34 = vand.u32 4294901760, %v6979_v17  ;;  %v6985_v22 = vand.u32 4294901760, %v4915_v29  ;;  %v6987_v19 = vand.u32 4294901760, %v4922_v41 }
  0x8b   :  { %4079 = vmatpush3.bf16.msra.mxu1 %v4078_v15  ;;  %4256 = vmatprep.subr.bf16.mxu0 %v6945_v44  ;;  %v4263_v15 = vpack.c.bf16 %v4952_v8, %v4948_v2  ;;  %v6989_v39 = vand.u32 4294901760, %v4926_v43  ;;  %v6990_v55 = vand.u32 4294901760, %v4930_v48  ;;  %v6991_v17 = vand.u32 4294901760, %v4934_v50 }
  0x8c   :  { %4081 = vmatprep.subr.bf16.mxu1 %v4080_v47  ;;  %v6981_v47 = vand.u32 4294901760, %v6976_v45  ;;  %v5333_v24 = vpack.c.bf16 %v6983_v26, %v6982_v49  ;;  %v6988_v45 = vand.u32 4294901760, %v4924_v42  ;;  %v6992_v29 = vand.u32 4294901760, %v4937_v52 }
  0x8d   :  { %3664 = vmatmul.mubr.f32.vlgmr.msra.gmra.mrb[0].mxu0 %v5093_v23  ;;  %v5339_v23 = vpack.c.bf16 %v6985_v22, %v6984_v34  ;;  %v6993_v41 = vand.u32 4294901760, %v4939_v54  ;;  %v6994_v42 = vand.u32 4294901760, %v4946_v63  ;;  %v6995_v43 = vand.u32 4294901760, %v4948_v2 }
  0x8e   :  { %v5327_v32 = vpack.c.bf16 %v6981_v47, %v6980_v11  ;;  %448 = vmatmul.mubr.f32.vlgmr.msra.gmra.mrb[2].mxu1 %v6986_v59  ;;  %4258 = vmatpush3.bf16.msra.mxu0 %v4257_v46  ;;  %v5346_v11 = vpack.c.bf16 %v6988_v45, %v6987_v19  ;;  %v5352_v47 = vpack.c.bf16 %v6990_v55, %v6989_v39  ;;  %v6996_v48 = vand.u32 4294901760, %v4952_v8 }
  0x8f   :  { %v5358_v22 = vpack.c.bf16 %v6992_v29, %v6991_v17  ;;  %4083 = vmatpush3.bf16.msra.mxu1 %v4082_v20  ;;  %4259 = vmatprep.subr.bf16.mxu0 %v6945_v44  ;;  %v5365_v46 = vpack.c.bf16 %v6994_v42, %v6993_v41  ;;  %v6997_v50 = vand.u32 4294901760, %v4956_v10  ;;  %v6998_v52 = vand.u32 4294901760, %v4959_v14 }
  0x90   :  { %v5371_v49 = vpack.c.bf16 %v6996_v48, %v6995_v43  ;;  %4085 = vmatprep.subr.bf16.mxu1 %v4084_v28  ;;  %583 = vmatprep.mubr.f32.mxu1 %v5102_v61  ;;  %v6999_v54 = vand.u32 4294901760, %v4963_v16  ;;  %v7000_v63 = vand.u32 4294901760, %v4965_v21  ;;  %v7001_v2 = vand.u32 4294901760, %v4973_v37 }
  0x91   :  { %v5377_v26 = vpack.c.bf16 %v6998_v52, %v6997_v50  ;;  %v7002_v8 = vand.u32 4294901760, %v4975_v38  ;;  %v7003_v10 = vand.u32 4294901760, %v4979_v51  ;;  %v7004_v14 = vand.u32 4294901760, %v4981_v53  ;;  %3698 = vmatprep.mubr.msk.f32.mxu0 %vm4836_vm0, %v6970_v25 }
  0x92   :  { %v5384_v20 = vpack.c.bf16 %v7000_v63, %v6999_v54  ;;  %v7005_v28 = vand.u32 4294901760, %v4985_v56  ;;  %v7006_v45 = vand.u32 4294901760, %v4989_v60  ;;  %v7007_v55 = vand.u32 4294901760, %v4993_v3  ;;  %4261 = vmatpush3.bf16.msra.mxu0 %v4260_v57 }
  0x93   :  { %v5390_v34 = vpack.c.bf16 %v7002_v8, %v7001_v2  ;;  %v5396_v19 = vpack.c.bf16 %v7004_v14, %v7003_v10  ;;  %v7008_v17 = vand.u32 4294901760, %v4997_v5  ;;  %v7009_v41 = vand.u32 4294901760, %v4999_v30  ;;  %4087 = vmatpush3.bf16.msra.mxu1 %v4086_v1  ;;  %4262 = vmatprep.subr.bf16.mxu0 %v6945_v44 }
  0x94   :  { %v5404_v39 = vpack.c.bf16 %v7006_v45, %v7005_v28  ;;  %v7010_v42 = vand.u32 4294901760, %v5003_v36  ;;  %v7011_v48 = vand.u32 4294901760, %v5007_v13  ;;  %v7012_v50 = vand.u32 4294901760, %v5010_v35  ;;  %4089 = vmatprep.subr.bf16.mxu1 %v4088_v27  ;;  %v7051_v27 = vld [vmem:[#allocation28_spill] sm:$0xff] }
  0x95   :  { %v5410_v29 = vpack.c.bf16 %v7008_v17, %v7007_v55  ;;  %v7013_v54 = vand.u32 4294901760, %v5014_v7  ;;  %v7014_v63 = vand.u32 4294901760, %v5016_v62  ;;  %v7015_v8 = vand.u32 4294901760, %v6971_v18 }
  0x96   :  { %v5416_v43 = vpack.c.bf16 %v7010_v42, %v7009_v41  ;;  %v5422_v52 = vpack.c.bf16 %v7012_v50, %v7011_v48  ;;  %v7016_v10 = vand.u32 4294901760, %v5025_v58  ;;  %v7017_v28 = vand.u32 4294901760, %v5029_v33  ;;  %4264 = vmatpush3.bf16.msra.mxu0 %v4263_v15  ;;  %v7052_v15 = vld [vmem:[#allocation29_spill] sm:$0xff] }
  0x97   :  { %v5428_v2 = vpack.c.bf16 %v7014_v63, %v7013_v54  ;;  %v7018_v45 = vand.u32 4294901760, %v5032_v0  ;;  %v7020_v57 = vand.u32 4294901760, %v6972_v9  ;;  %v7021_v17 = vand.u32 4294901760, %v6973_v12  ;;  %v7026_v54 = vld [vmem:[#allocation41_spill] sm:$0xff]  ;;  %4091 = vmatpush3.bf16.msra.mxu1 %v4090_v40  ;;  %4265 = vmatprep.subr.bf16.mxu0 %v6945_v44  ;;  %v7053_v40 = vld [vmem:[#allocation30_spill] sm:$0xff] }
  0x98   :  { %v5434_v14 = vpack.c.bf16 %v7016_v10, %v7015_v8  ;;  %v7023_v42 = vand.u32 4294901760, %v5044_v4  ;;  %v7024_v48 = vand.u32 4294901760, %v5046_v6  ;;  %v7027_v63 = vand.u32 4294901760, %v7026_v54  ;;  %v7028_v8 = vld [vmem:[#allocation43_spill] sm:$0xff] }
  0x99   :  { %v5440_v55 = vpack.c.bf16 %v7018_v45, %v7017_v28  ;;  %v5446_v41 = vpack.c.bf16 %v7021_v17, %v7020_v57  ;;  %v7029_v10 = vand.u32 4294901760, %v7028_v8  ;;  %v7030_v45 = vld [vmem:[#allocation45_spill] sm:$0xff]  ;;  %v4092_v1 = vpack.c.bf16 %v4965_v21, %v4963_v16 }
  0x9a   :  { %v5453_v50 = vpack.c.bf16 %v7024_v48, %v7023_v42  ;;  %v7031_v59 = vand.u32 4294901760, %v7030_v45  ;;  %v7035_v42 = vld [vmem:[#allocation49_spill] sm:$0xff]  ;;  %v4096_v16 = vpack.c.bf16 %v4989_v60, %v4985_v56  ;;  %v4269_v21 = vpack.c.bf16 %v4997_v5, %v4993_v3  ;;  %v7037_v3 = vld [vmem:[#allocation12_spill] sm:$0xff] }
  0x9b   :  { %7019 = vst [vmem:[#allocation34_spill] sm:$0xff] %v5440_v55  ;;  %7022 = vst [vmem:[#allocation38_spill] sm:$0xff] %v5446_v41  ;;  %v5459_v28 = vpack.c.bf16 %v7029_v10, %v7027_v63  ;;  %v7032_v55 = vld [vmem:[#allocation46_spill] sm:$0xff]  ;;  %v7034_v41 = vand.u32 4294901760, %v5067_v31  ;;  %v7036_v48 = vand.u32 4294901760, %v7035_v42  ;;  %v4266_v63 = vpack.c.bf16 %v4975_v38, %v4973_v37  ;;  %4093 = vmatprep.subr.bf16.mxu1 %v4092_v1  ;;  %v7038_v5 = vld [vmem:[#allocation53_spill] sm:$0xff] }
  0x9c   :  { %7025 = vst [vmem:[#allocation39_spill] sm:$0xff] %v5453_v50  ;;  %v7033_v57 = vand.u32 4294901760, %v7032_v55  ;;  %v4098_v37 = vpack.c.bf16 %v5003_v36, %v4999_v30  ;;  %v4100_v38 = vpack.c.bf16 %v5010_v35, %v5007_v13  ;;  %v4104_v56 = vpack.c.bf16 %v5032_v0, %v5029_v33  ;;  %v7039_v30 = vld [vmem:[#allocation50_spill] sm:$0xff]  ;;  %v7040_v33 = vld [vmem:[#allocation16_spill] sm:$0xff] }
  0x9d   :  { %v5473_v50 = vpack.c.bf16 %v7036_v48, %v7034_v41  ;;  %4267 = vmatpush3.bf16.msra.mxu0 %v4266_v63  ;;  %v4275_v36 = vpack.c.bf16 %v6973_v12, %v6972_v9  ;;  %v4278_v60 = vpack.c.bf16 %v7032_v55, %v7030_v45  ;;  %v4110_v0 = vpack.c.bf16 %v7035_v42, %v5067_v31  ;;  %v7041_v13 = vld [vmem:[#allocation18_spill] sm:$0xff]  ;;  %v7042_v35 = vld [vmem:[#allocation20_spill] sm:$0xff]  ;;  %v7054_v55 = vld [vmem:[#allocation31_spill] sm:$0xff] }
  0x9e   :  { %v5465_v17 = vpack.c.bf16 %v7033_v57, %v7031_v59  ;;  %v4094_v59 = vpack.c.bf16 %v4981_v53, %v4979_v51  ;;  %4268 = vmatprep.subr.bf16.mxu0 %v6945_v44  ;;  %v4272_v51 = vpack.c.bf16 %v5016_v62, %v5014_v7  ;;  %v4102_v53 = vpack.c.bf16 %v5025_v58, %v6971_v18  ;;  %v7044_v58 = vld [vmem:[#allocation21_spill] sm:$0xff]  ;;  %v7047_v12 = vld [vmem:[#allocation24_spill] sm:$0xff]  ;;  %v7049_v9 = vld [vmem:[#allocation26_spill] sm:$0xff] }
  0x9f   :  { %v4106_v62 = vpack.c.bf16 %v5046_v6, %v5044_v4  ;;  %v4108_v7 = vpack.c.bf16 %v7028_v8, %v7026_v54  ;;  %v7043_v31 = vand.u32 4294901760, %v5102_v61  ;;  %v7045_v4 = vld [vmem:[#allocation22_spill] sm:$0xff]  ;;  %v7046_v6 = vld [vmem:[#allocation23_spill] sm:$0xff]  ;;  %v7048_v18 = vld [vmem:[#allocation25_spill] sm:$0xff]  ;;  %v7064_v63 = vand.u32 4294901760, %v7038_v5 }
  0xa0   :  { %4095 = vmatpush3.bf16.msra.mxu1 %v4094_v59  ;;  %v7050_v61 = vld [vmem:[#allocation27_spill] sm:$0xff]  ;;  %v7055_v41 = vld [vmem:[#allocation32_spill] sm:$0xff]  ;;  %v7056_v54 = vld [vmem:[#allocation33_spill] sm:$0xff]  ;;  %v7065_v59 = vand.u32 4294901760, %v7039_v30 }
  0xa1   :  { %4097 = vmatprep.subr.bf16.mxu1 %v4096_v16  ;;  %4270 = vmatpush3.bf16.msra.mxu0 %v4269_v21  ;;  %v7057_v8 = vld [vmem:[#allocation35_spill] sm:$0xff]  ;;  %v7058_v10 = vld [vmem:[#allocation36_spill] sm:$0xff]  ;;  %v7059_v45 = vld [vmem:[#allocation37_spill] sm:$0xff] }
  0xa2   :  { %4271 = vmatprep.subr.bf16.mxu0 %v6945_v44  ;;  %v7060_v57 = vld [vmem:[#allocation40_spill] sm:$0xff]  ;;  %v7061_v1 = vld [vmem:[#allocation42_spill] sm:$0xff]  ;;  %v7063_v48 = vld [vmem:[#allocation47_spill] sm:$0xff] }
  0xa3   :  { %v7062_v42 = vld [vmem:[#allocation44_spill] sm:$0xff]  ;;  %v7066_v16 = vld [vmem:[#allocation51_spill] sm:$0xff] }
  0xa4   :  { %4099 = vmatpush3.bf16.msra.mxu1 %v4098_v37  ;;  %v5643_v37 = vld [vmem:[#allocation7 + $0x38] sm:$0xff] }
  0xa5   :  { %4101 = vmatprep.subr.bf16.mxu1 %v4100_v38  ;;  %4273 = vmatpush3.bf16.msra.mxu0 %v4272_v51  ;;  %v5645_v38 = vld [vmem:[#allocation7 + $0x50] sm:$0xff] }
  0xa6   :  { %4274 = vmatprep.subr.bf16.mxu0 %v6945_v44 }
  0xa8   :  { %4103 = vmatpush3.bf16.msra.mxu1 %v4102_v53  ;;  %v6801_v53 = vand.u32 4294901760, %v5643_v37 }
  0xa9   :  { %4105 = vmatprep.subr.bf16.mxu1 %v4104_v56  ;;  %4276 = vmatpush3.bf16.msra.mxu0 %v4275_v36  ;;  %v6800_v56 = vand.u32 4294901760, %v5645_v38  ;;  %v5651_v36 = vld [vmem:[#allocation7 + $0x30] sm:$0xff] }
  0xaa   :  { %4277 = vmatprep.subr.bf16.mxu0 %v6945_v44 }
  0xac   :  { %4107 = vmatpush3.bf16.msra.mxu1 %v4106_v62  ;;  %v5653_v62 = vld [vmem:[#allocation7 + $0x48] sm:$0xff] }
  0xad   :  { %4109 = vmatprep.subr.bf16.mxu1 %v4108_v7  ;;  %4279 = vmatpush3.bf16.msra.mxu0 %v4278_v60  ;;  %v5655_v7 = vld [vmem:[#allocation7 + $0x40] sm:$0xff] }
  0xae   :  { %4280 = vmatprep.subr.bf16.mxu0 %v6945_v44 }
  0xb0   :  { %4111 = vmatpush3.bf16.msra.mxu1 %v4110_v0  ;;  %3699 = vmatmul.mubr.f32.vlgmr.msra.gmra.mrb[0].mxu0 %v7038_v5 }
  0xb1   :  { %4113 = vmatprep.subr.bf16.mxu1 %v7037_v3  ;;  %4282 = vmatpush3.bf16.msra.mxu0 %v7040_v33 }
  0xb2   :  { %4283 = vmatprep.subr.bf16.mxu0 %v6945_v44  ;;  %3733 = vmatprep.mubr.msk.f32.mxu0 %vm4836_vm0, %v6970_v25 }
  0xb3   :  { %586 = vmatmul.mubr.f32.vlgmr.msra.gmra.mrb[4].mxu1 %v7039_v30  ;;  %v5666_v30 = vld [vmem:[#allocation7 + $0x58] sm:$0xff] }
  0xb4   :  { %4115 = vmatpush3.bf16.msra.mxu1 %v7041_v13  ;;  %690 = vmatprep.mubr.f32.mxu1 %v7043_v31  ;;  %v6798_v31 = vand.u32 4294901760, %v5653_v62 }
  0xb5   :  { %4117 = vmatprep.subr.bf16.mxu1 %v7042_v35  ;;  %4285 = vmatpush3.bf16.msra.mxu0 %v7044_v58 }
  0xb6   :  { %4286 = vmatprep.subr.bf16.mxu0 %v6945_v44 }
  0xb8   :  { %4119 = vmatpush3.bf16.msra.mxu1 %v7045_v4 }
  0xb9   :  { %4121 = vmatprep.subr.bf16.mxu1 %v7046_v6  ;;  %4288 = vmatpush3.bf16.msra.mxu0 %v7047_v12 }
  0xba   :  { %4289 = vmatprep.subr.bf16.mxu0 %v6945_v44 }
  0xbc   :  { %4123 = vmatpush3.bf16.msra.mxu1 %v7048_v18 }
  0xbd   :  { %4125 = vmatprep.subr.bf16.mxu1 %v7049_v9  ;;  %4291 = vmatpush3.bf16.msra.mxu0 %v7050_v61 }
  0xbe   :  { %4292 = vmatprep.subr.bf16.mxu0 %v6945_v44 }
  0xc0   :  { %4127 = vmatpush3.bf16.msra.mxu1 %v7051_v27 }
  0xc1   :  { %4129 = vmatprep.subr.bf16.mxu1 %v7052_v15  ;;  %4294 = vmatpush3.bf16.msra.mxu0 %v7053_v40 }
  0xc2   :  { %4295 = vmatprep.subr.bf16.mxu0 %v6945_v44 }
  0xc4   :  { %4131 = vmatpush3.bf16.msra.mxu1 %v7054_v55 }
  0xc5   :  { %4133 = vmatprep.subr.bf16.mxu1 %v7055_v41  ;;  %4297 = vmatpush3.bf16.msra.mxu0 %v7056_v54 }
  0xc6   :  { %4298 = vmatprep.subr.bf16.mxu0 %v6945_v44 }
  0xc8   :  { %4135 = vmatpush3.bf16.msra.mxu1 %v7057_v8 }
  0xc9   :  { %4137 = vmatprep.subr.bf16.mxu1 %v7058_v10  ;;  %4300 = vmatpush3.bf16.msra.mxu0 %v7059_v45 }
  0xca   :  { %4301 = vmatprep.subr.bf16.mxu0 %v6945_v44 }
  0xcc   :  { %4139 = vmatpush3.bf16.msra.mxu1 %v7060_v57 }
  0xcd   :  { %4141 = vmatprep.subr.bf16.mxu1 %v7061_v1  ;;  %4303 = vmatpush3.bf16.msra.mxu0 %v7062_v42 }
  0xce   :  { %4304 = vmatprep.subr.bf16.mxu0 %v6945_v44 }
  0xd0   :  { %4143 = vmatpush3.bf16.msra.mxu1 %v7063_v48  ;;  %3734 = vmatmul.mubr.f32.vlgmr.msra.gmra.mrb[0].mxu0 %v7064_v63 }
  0xd1   :  { %4145 = vmatprep.subr.bf16.mxu1 %v5327_v32  ;;  %4306 = vmatpush3.bf16.msra.mxu0 %v5333_v24  ;;  %v7068_v32 = vld [vmem:[#allocation38_spill] sm:$0xff]  ;;  %v7069_v24 = vld [vmem:[#allocation39_spill] sm:$0xff] }
  0xd2   :  { %4307 = vmatprep.subr.bf16.mxu0 %v6945_v44  ;;  %3768 = vmatprep.mubr.msk.f32.mxu0 %vm4836_vm0, %v6970_v25 }
  0xd3   :  { %694 = vmatmul.mubr.f32.vlgmr.msra.gmra.mrb[6].mxu1 %v7065_v59  ;;  %v5727_v59 = vld [vmem:[#allocation7 + $0x98] sm:$0xff] }
  0xd4   :  { %4147 = vmatpush3.bf16.msra.mxu1 %v5339_v23  ;;  %860 = vmatprep.mubr.f32.mxu1 %v7066_v16  ;;  %v7067_v23 = vld [vmem:[#allocation34_spill] sm:$0xff] }
  0xd5   :  { %4149 = vmatprep.subr.bf16.mxu1 %v5346_v11  ;;  %4309 = vmatpush3.bf16.msra.mxu0 %v5352_v47  ;;  %v7070_v11 = vld [vmem:[#allocation52_spill] sm:$0xff] }
  0xd6   :  { %4310 = vmatprep.subr.bf16.mxu0 %v6945_v44  ;;  %v7071_v47 = vld [vmem:[#allocation48_spill] sm:$0xff] }
  0xd8   :  { %4151 = vmatpush3.bf16.msra.mxu1 %v5358_v22 }
  0xd9   :  { %4153 = vmatprep.subr.bf16.mxu1 %v5365_v46  ;;  %4312 = vmatpush3.bf16.msra.mxu0 %v5371_v49 }
  0xda   :  { %4313 = vmatprep.subr.bf16.mxu0 %v6945_v44 }
  0xdc   :  { %4155 = vmatpush3.bf16.msra.mxu1 %v5377_v26  ;;  %v5628_v26 = vld [vmem:[#allocation7 + $0x8] sm:$0xff] }
  0xdd   :  { %4157 = vmatprep.subr.bf16.mxu1 %v5384_v20  ;;  %4315 = vmatpush3.bf16.msra.mxu0 %v5390_v34  ;;  %v5630_v20 = vld [vmem:[#allocation7 + $0x20] sm:$0xff]  ;;  %v6805_v34 = vand.u32 4294901760, %v5628_v26 }
  0xde   :  { %4316 = vmatprep.subr.bf16.mxu0 %v6945_v44 }
  0xe0   :  { %4159 = vmatpush3.bf16.msra.mxu1 %v5396_v19  ;;  %v6802_v19 = vand.u32 4294901760, %v5630_v20 }
  0xe1   :  { %4161 = vmatprep.subr.bf16.mxu1 %v5404_v39  ;;  %4318 = vmatpush3.bf16.msra.mxu0 %v5410_v29  ;;  %v1614_v29 = vld [vmem:[#allocation7] sm:$0xff] }
  0xe2   :  { %4319 = vmatprep.subr.bf16.mxu0 %v6945_v44  ;;  %v5638_v39 = vpack.c.bf16 %v6802_v19, %v6805_v34  ;;  %v1654_v34 = vld [vmem:[#allocation7 + $0x140] sm:$0xff] }
  0xe4   :  { %4163 = vmatpush3.bf16.msra.mxu1 %v5416_v43  ;;  %7072 = vst [vmem:[#allocation13_spill] sm:$0xff] %v5638_v39  ;;  %v1617_v43 = vld [vmem:[#allocation7 + $0x18] sm:$0xff] }
  0xe5   :  { %4165 = vmatprep.subr.bf16.mxu1 %v5422_v52  ;;  %4321 = vmatpush3.bf16.msra.mxu0 %v5428_v2  ;;  %v1616_v52 = vld [vmem:[#allocation7 + $0x10] sm:$0xff]  ;;  %v1664_v2 = vand.u32 4294901760, %v1614_v29 }
  0xe6   :  { %4322 = vmatprep.subr.bf16.mxu0 %v6945_v44 }
  0xe7   :  { %v5658_v60 = vsub.f32 %v1614_v29, %v1664_v2  ;;  %v5749_v29 = vld [vmem:[#allocation7 + $0xb8] sm:$0xff] }
  0xe8   :  { %4167 = vmatpush3.bf16.msra.mxu1 %v5434_v14  ;;  %v1668_v14 = vand.u32 4294901760, %v1617_v43 }
  0xe9   :  { %4169 = vmatprep.subr.bf16.mxu1 %v7067_v23  ;;  %4324 = vmatpush3.bf16.msra.mxu0 %v7068_v32  ;;  %7075 = vst [vmem:[#allocation17_spill] sm:$0xff] %v5658_v60  ;;  %v6783_v32 = vand.u32 4294901760, %v5727_v59 }
  0xea   :  { %4325 = vmatprep.subr.bf16.mxu0 %v6945_v44  ;;  %v5641_v21 = vpack.c.bf16 %v1668_v14, %v1664_v2  ;;  %v5660_v0 = vsub.f32 %v1617_v43, %v1668_v14  ;;  %v6786_v2 = vand.u32 4294901760, %v5749_v29 }
  0xec   :  { %4171 = vmatpush3.bf16.msra.mxu1 %v7069_v24  ;;  %7073 = vst [vmem:[#allocation14_spill] sm:$0xff] %v5641_v21  ;;  %7076 = vst [vmem:[#allocation19_spill] sm:$0xff] %v5660_v0 }
  0xed   :  { %4173 = vmatprep.subr.bf16.mxu1 %v5459_v28  ;;  %4327 = vmatpush3.bf16.msra.mxu0 %v5465_v17  ;;  %v2518_v28 = vand.u32 4294901760, %v1616_v52 }
  0xee   :  { %4328 = vmatprep.subr.bf16.mxu0 %v6945_v44 }
  0xf0   :  { %4175 = vmatpush3.bf16.msra.mxu1 %v5473_v50  ;;  %3769 = vmatmul.mubr.f32.vlgmr.msra.gmra.mrb[0].mxu0 %v7070_v11  ;;  %v1619_v50 = vld [vmem:[#allocation7 + $0x28] sm:$0xff] }
  0xf1   :  { %4177 = vmatprep.subr.bf16.mxu1 %v7037_v3  ;;  %4330 = vmatpush3.bf16.msra.mxu0 %v7040_v33  ;;  %v2521_v17 = vand.u32 4294901760, %v1619_v50  ;;  %v5662_v3 = vsub.f32 %v1616_v52, %v2518_v28 }
  0xf2   :  { %4331 = vmatprep.subr.bf16.mxu0 %v6945_v44  ;;  %3803 = vmatprep.mubr.msk.f32.mxu0 %vm4836_vm0, %v6970_v25 }
  0xf3   :  { %862 = vmatmul.mubr.f32.vlgmr.msra.gmra.mrb[8].mxu1 %v7071_v47  ;;  %v5647_v51 = vpack.c.bf16 %v2521_v17, %v2518_v28  ;;  %v5664_v5 = vsub.f32 %v1619_v50, %v2521_v17  ;;  %v5767_v50 = vld [vmem:[#allocation7 + $0xc8] sm:$0xff]  ;;  %v5769_v28 = vld [vmem:[#allocation7 + $0xe0] sm:$0xff] }
  0xf4   :  { %4179 = vmatpush3.bf16.msra.mxu1 %v7041_v13  ;;  %964 = vmatprep.mubr.f32.mxu1 %v7066_v16  ;;  %v5673_v13 = vpack.c.bf16 %v6800_v56, %v6801_v53  ;;  %v5729_v16 = vld [vmem:[#allocation7 + $0xb0] sm:$0xff] }
  0xf5   :  { %4181 = vmatprep.subr.bf16.mxu1 %v7042_v35  ;;  %4333 = vmatpush3.bf16.msra.mxu0 %v7044_v58  ;;  %7074 = vst [vmem:[#allocation15_spill] sm:$0xff] %v5647_v51  ;;  %7077 = vst [vmem:[#allocation41_spill] sm:$0xff] %v5664_v5  ;;  %v6799_v35 = vand.u32 4294901760, %v5651_v36  ;;  %v6797_v58 = vand.u32 4294901760, %v5655_v7  ;;  %v6782_v24 = vand.u32 4294901760, %v5729_v16 }
  0xf6   :  { %4334 = vmatprep.subr.bf16.mxu0 %v6945_v44  ;;  %7078 = vst [vmem:[#allocation43_spill] sm:$0xff] %v5673_v13 }
  0xf7   :  { %v5757_v52 = vpack.c.bf16 %v6782_v24, %v6783_v32 }
  0xf8   :  { %4183 = vmatpush3.bf16.msra.mxu1 %v7045_v4 }
  0xf9   :  { %4185 = vmatprep.subr.bf16.mxu1 %v7046_v6  ;;  %4336 = vmatpush3.bf16.msra.mxu0 %v7047_v12  ;;  %v6796_v6 = vand.u32 4294901760, %v5666_v30  ;;  %v5680_v12 = vld [vmem:[#allocation7 + $0x68] sm:$0xff]  ;;  %7085 = vst [vmem:[#allocation16_spill] sm:$0xff] %v5757_v52 }
  0xfa   :  { %4337 = vmatprep.subr.bf16.mxu0 %v6945_v44 }
  0xfc   :  { %4187 = vmatpush3.bf16.msra.mxu1 %v7048_v18  ;;  %v5682_v18 = vld [vmem:[#allocation7 + $0x80] sm:$0xff] }
  0xfd   :  { %4189 = vmatprep.subr.bf16.mxu1 %v7049_v9  ;;  %4339 = vmatpush3.bf16.msra.mxu0 %v7050_v61  ;;  %v5689_v61 = vpack.c.bf16 %v6798_v31, %v6799_v35  ;;  %v1649_v35 = vld [vmem:[#allocation7 + $0x118] sm:$0xff] }
  0xfe   :  { %4340 = vmatprep.subr.bf16.mxu0 %v6945_v44  ;;  %v2551_v19 = vand.u32 4294901760, %v1649_v35 }
  0xff   :  { %7079 = vst [vmem:[#allocation45_spill] sm:$0xff] %v5689_v61 }
 0x100   :  { %4191 = vmatpush3.bf16.msra.mxu1 %v7051_v27  ;;  %v6793_v27 = vand.u32 4294901760, %v5680_v12 }
 0x101   :  { %4193 = vmatprep.subr.bf16.mxu1 %v7052_v15  ;;  %4342 = vmatpush3.bf16.msra.mxu0 %v7053_v40  ;;  %v6790_v15 = vand.u32 4294901760, %v5682_v18  ;;  %v5693_v40 = vld [vmem:[#allocation7 + $0x60] sm:$0xff] }
 0x102   :  { %4343 = vmatprep.subr.bf16.mxu0 %v6945_v44 }
 0x104   :  { %4195 = vmatpush3.bf16.msra.mxu1 %v7054_v55  ;;  %v5695_v55 = vld [vmem:[#allocation7 + $0x78] sm:$0xff] }
 0x105   :  { %4197 = vmatprep.subr.bf16.mxu1 %v7055_v41  ;;  %4345 = vmatpush3.bf16.msra.mxu0 %v7056_v54  ;;  %v5697_v41 = vld [vmem:[#allocation7 + $0x70] sm:$0xff]  ;;  %v5703_v54 = vpack.c.bf16 %v6796_v6, %v6797_v58  ;;  %v5821_v6 = vld [vmem:[#allocation7 + $0x100] sm:$0xff] }
 0x106   :  { %4346 = vmatprep.subr.bf16.mxu0 %v6945_v44  ;;  %v2548_v56 = vand.u32 4294901760, %v5821_v6 }
 0x107   :  { %7080 = vst [vmem:[#allocation46_spill] sm:$0xff] %v5703_v54 }
 0x108   :  { %4199 = vmatpush3.bf16.msra.mxu1 %v7057_v8  ;;  %v6789_v8 = vand.u32 4294901760, %v5693_v40 }
 0x109   :  { %4201 = vmatprep.subr.bf16.mxu1 %v7058_v10  ;;  %4348 = vmatpush3.bf16.msra.mxu0 %v7059_v45  ;;  %v6788_v10 = vand.u32 4294901760, %v5695_v55  ;;  %v5707_v45 = vld [vmem:[#allocation7 + $0x88] sm:$0xff] }
 0x10a   :  { %4349 = vmatprep.subr.bf16.mxu0 %v6945_v44 }
 0x10b   :  { %v5725_v63 = vpack.c.bf16 %v6788_v10, %v6789_v8  ;;  %v5807_v8 = vld [vmem:[#allocation7 + $0xf8] sm:$0xff] }
 0x10c   :  { %4203 = vmatpush3.bf16.msra.mxu1 %v7060_v57  ;;  %v6785_v57 = vand.u32 4294901760, %v5697_v41 }
 0x10d   :  { %4205 = vmatprep.subr.bf16.mxu1 %v7061_v1  ;;  %4351 = vmatpush3.bf16.msra.mxu0 %v7062_v42  ;;  %v5717_v42 = vpack.c.bf16 %v6790_v15, %v6793_v27  ;;  %7083 = vst [vmem:[#allocation53_spill] sm:$0xff] %v5725_v63  ;;  %v5809_v15 = vld [vmem:[#allocation7 + $0x110] sm:$0xff] }
 0x10e   :  { %4544 = vmatprep.subr.bf16.mxu0 %v6945_v44  ;;  %v1706_v27 = vand.u32 4294901760, %v5809_v15 }
 0x10f   :  { %7082 = vst [vmem:[#allocation12_spill] sm:$0xff] %v5717_v42 }
 0x110   :  { %4207 = vmatpush3.bf16.msra.mxu1 %v7063_v48  ;;  %3804 = vmatmul.mubr.f32.vlgmr.msra.gmra.mrb[0].mxu0 %v7070_v11  ;;  %v6784_v48 = vand.u32 4294901760, %v5707_v45  ;;  %v5741_v11 = vld [vmem:[#allocation7 + $0x90] sm:$0xff] }
 0x111   :  { %3838 = vmatprep.mubr.msk.f32.mxu0 %vm4836_vm0, %v6970_v25  ;;  %4353 = vmatprep.subr.bf16.mxu1 %v5638_v39 }
 0x112   :  { %4546 = vmatpush3.bf16.msra.mxu0 %v5647_v51  ;;  %v5737_v23 = vpack.c.bf16 %v6784_v48, %v6785_v57  ;;  %v5789_v48 = vld [vmem:[#allocation7 + $0xe8] sm:$0xff] }
 0x113   :  { %966 = vmatmul.mubr.f32.vlgmr.msra.gmra.mrb[10].mxu1 %v7071_v47  ;;  %4547 = vmatprep.subr.bf16.mxu0 %v6945_v44  ;;  %v5743_v47 = vld [vmem:[#allocation7 + $0xa8] sm:$0xff] }
 0x114   :  { %1758 = vmatprep.mubr.f32.mxu1 %v6970_v25  ;;  %4355 = vmatpush1.bf16.msra.mxu1 %v5641_v21  ;;  %7084 = vst [vmem:[#allocation50_spill] sm:$0xff] %v5737_v23  ;;  %v7097_v25 = vand.u32 4294901760, %v5643_v37 }
 0x115   :  { %4357 = vmatprep.subr.bf16.mxu1 %v5673_v13 }
 0x116   :  { %4549 = vmatpush3.bf16.msra.mxu0 %v5703_v54  ;;  %v5850_v5 = vsub.f32 %v5643_v37, %v7097_v25  ;;  %v7102_v25 = vand.u32 4294901760, %v5655_v7 }
 0x117   :  { %4550 = vmatprep.subr.bf16.mxu0 %v6945_v44 }
 0x118   :  { %4359 = vmatpush1.bf16.msra.mxu1 %v5689_v61  ;;  %v1655_v61 = vld [vmem:[#allocation7 + $0x148] sm:$0xff]  ;;  %7098 = vst [vmem:[#allocation28_spill] sm:$0xff] %v5850_v5  ;;  %v5871_v37 = vsub.f32 %v5655_v7, %v7102_v25  ;;  %v7106_v7 = vand.u32 4294901760, %v5693_v40 }
 0x119   :  { %4361 = vmatprep.subr.bf16.mxu1 %v5717_v42  ;;  %v2557_v39 = vand.u32 4294901760, %v1655_v61 }
 0x11a   :  { %4552 = vmatpush3.bf16.msra.mxu0 %v5737_v23  ;;  %v1653_v23 = vld [vmem:[#allocation7 + $0x138] sm:$0xff]  ;;  %v5892_v25 = vsub.f32 %v5693_v40, %v7106_v7  ;;  %v7110_v40 = vand.u32 4294901760, %v5727_v59 }
 0x11b   :  { %4553 = vmatprep.subr.bf16.mxu0 %v6945_v44  ;;  %v1716_v51 = vand.u32 4294901760, %v1653_v23 }
 0x11c   :  { %4363 = vmatpush1.bf16.msra.mxu1 %v5725_v63  ;;  %v7094_v63 = vand.u32 4294901760, %v5628_v26  ;;  %v5913_v7 = vsub.f32 %v5727_v59, %v7110_v40  ;;  %v7115_v40 = vand.u32 4294901760, %v5749_v29 }
 0x11d   :  { %4365 = vmatprep.subr.bf16.mxu1 %v5757_v52  ;;  %v1650_v52 = vld [vmem:[#allocation7 + $0x120] sm:$0xff] }
 0x11e   :  { %v5837_v42 = vsub.f32 %v5628_v26, %v7094_v63  ;;  %v7099_v26 = vand.u32 4294901760, %v5645_v38 }
 0x120   :  { %v5855_v63 = vsub.f32 %v5645_v38, %v7099_v26  ;;  %v7103_v38 = vand.u32 4294901760, %v5666_v30 }
 0x122   :  { %v5876_v26 = vsub.f32 %v5666_v30, %v7103_v38  ;;  %v7107_v30 = vand.u32 4294901760, %v5695_v55 }
 0x124   :  { %v5897_v38 = vsub.f32 %v5695_v55, %v7107_v30  ;;  %v7111_v55 = vand.u32 4294901760, %v5729_v16 }
 0x126   :  { %v5918_v30 = vsub.f32 %v5729_v16, %v7111_v55  ;;  %v5938_v16 = vsub.f32 %v5749_v29, %v7115_v40  ;;  %v7116_v55 = vand.u32 4294901760, %v5767_v50 }
 0x139   :  { %v3214_v22 = vpop.f32.mrb[0].mxu1 }
 0x13a   :  { %v3215_v46 = vpop.f32.mrb[1].mxu1 }
 0x13b   :  { %v3216_v49 = vadd.f32 %v3215_v46, %v3214_v22  ;;  %v5745_v22 = vld [vmem:[#allocation7 + $0xa0] sm:$0xff]  ;;  %v6781_v46 = vand.u32 4294901760, %v5741_v11 }
 0x13c   :  { %v6787_v43 = vand.u32 4294901760, %v5745_v22 }
 0x13e   :  { %v5777_v17 = vpack.c.bf16 %v6786_v2, %v6787_v43  ;;  %v6803_v43 = vand.u32 4294901760, %v5789_v48 }
 0x140   :  { %7087 = vst [vmem:[#allocation20_spill] sm:$0xff] %v5777_v17  ;;  %4555 = vmatpush3.bf16.msra.mxu0 %v5777_v17 }
 0x141   :  { %4556 = vmatprep.subr.bf16.mxu0 %v6945_v44 }
 0x161   :  { %v3249_v33 = vpop.f32.mrb[2].mxu1 }
 0x162   :  { %v3250_v4 = vpop.f32.mrb[3].mxu1 }
 0x163   :  { %v3251_v9 = vadd.f32 %v3250_v4, %v3249_v33  ;;  %v6792_v33 = vand.u32 4294901760, %v5767_v50  ;;  %v6791_v4 = vand.u32 4294901760, %v5769_v28 }
 0x165   :  { %v5710_v1 = vadd.f32 %v3251_v9, %v3216_v49  ;;  %v6780_v49 = vand.u32 4294901760, %v5743_v47  ;;  %v5781_v9 = vld [vmem:[#allocation7 + $0xc0] sm:$0xff]  ;;  %v5797_v2 = vpack.c.bf16 %v6791_v4, %v6792_v33  ;;  %v1702_v33 = vand.u32 4294901760, %v5807_v8 }
 0x166   :  { %v6795_v24 = vand.u32 4294901760, %v5781_v9 }
 0x167   :  { %7081 = vst [vmem:[#allocation49_spill] sm:$0xff] %v5710_v1  ;;  %v5765_v14 = vpack.c.bf16 %v6780_v49, %v6781_v46  ;;  %v5783_v49 = vld [vmem:[#allocation7 + $0xd8] sm:$0xff]  ;;  %v5785_v46 = vld [vmem:[#allocation7 + $0xd0] sm:$0xff]  ;;  %7088 = vst [vmem:[#allocation21_spill] sm:$0xff] %v5797_v2  ;;  %v5825_v53 = vpack.c.bf16 %v1706_v27, %v1702_v33 }
 0x168   :  { %v6794_v32 = vand.u32 4294901760, %v5783_v49  ;;  %v6804_v57 = vand.u32 4294901760, %v5785_v46  ;;  %v7121_v40 = vand.u32 4294901760, %v5785_v46 }
 0x169   :  { %7086 = vst [vmem:[#allocation18_spill] sm:$0xff] %v5765_v14  ;;  %4367 = vmatpush1.bf16.msra.mxu1 %v5765_v14  ;;  %7091 = vst [vmem:[#allocation24_spill] sm:$0xff] %v5825_v53  ;;  %v1714_v14 = vand.u32 4294901760, %v1654_v34 }
 0x16a   :  { %v5805_v10 = vpack.c.bf16 %v6794_v32, %v6795_v24  ;;  %4369 = vmatprep.subr.bf16.mxu1 %v5797_v2  ;;  %v5817_v4 = vpack.c.bf16 %v6803_v43, %v6804_v57  ;;  %v1644_v32 = vld [vmem:[#allocation7 + $0xf0] sm:$0xff]  ;;  %v1647_v24 = vld [vmem:[#allocation7 + $0x108] sm:$0xff]  ;;  %v5832_v2 = vpack.c.bf16 %v2551_v19, %v2548_v56 }
 0x16b   :  { %v1704_v58 = vand.u32 4294901760, %v1644_v32  ;;  %v1708_v31 = vand.u32 4294901760, %v1647_v24  ;;  %v1651_v57 = vld [vmem:[#allocation7 + $0x128] sm:$0xff] }
 0x16c   :  { %7089 = vst [vmem:[#allocation22_spill] sm:$0xff] %v5805_v10  ;;  %7090 = vst [vmem:[#allocation23_spill] sm:$0xff] %v5817_v4  ;;  %4558 = vmatpush3.bf16.msra.mxu0 %v5817_v4  ;;  %v1710_v17 = vand.u32 4294901760, %v1651_v57  ;;  %v7095_v4 = vand.u32 4294901760, %v5630_v20 }
 0x16d   :  { %4371 = vmatpush1.bf16.msra.mxu1 %v5805_v10  ;;  %v5828_v43 = vpack.c.bf16 %v1708_v31, %v1704_v58  ;;  %4559 = vmatprep.subr.bf16.mxu0 %v6945_v44  ;;  %7093 = vst [vmem:[#allocation26_spill] sm:$0xff] %v5832_v2  ;;  %v1652_v10 = vld [vmem:[#allocation7 + $0x130] sm:$0xff] }
 0x16e   :  { %4373 = vmatprep.subr.bf16.mxu1 %v5825_v53  ;;  %v5842_v54 = vsub.f32 %v5630_v20, %v7095_v4  ;;  %v1712_v53 = vand.u32 4294901760, %v1650_v52  ;;  %v5845_v13 = vpack.c.bf16 %v1714_v14, %v1710_v17  ;;  %v2554_v21 = vand.u32 4294901760, %v1652_v10 }
 0x16f   :  { %7092 = vst [vmem:[#allocation25_spill] sm:$0xff] %v5828_v43  ;;  %v7100_v20 = vand.u32 4294901760, %v5651_v36 }
 0x170   :  { %7096 = vst [vmem:[#allocation27_spill] sm:$0xff] %v5845_v13  ;;  %4561 = vmatpush3.bf16.msra.mxu0 %v5832_v2  ;;  %v1660_v2 = vld [vmem:[#allocation7 + $0x170] sm:$0xff] }
 0x171   :  { %4375 = vmatpush1.bf16.msra.mxu1 %v5828_v43  ;;  %v5860_v4 = vsub.f32 %v5651_v36, %v7100_v20  ;;  %v7101_v43 = vand.u32 4294901760, %v5653_v62  ;;  %v7104_v36 = vand.u32 4294901760, %v5680_v12  ;;  %4562 = vmatprep.subr.bf16.mxu0 %v6945_v44 }
 0x172   :  { %4377 = vmatprep.subr.bf16.mxu1 %v5845_v13  ;;  %v7114_v13 = vand.u32 4294901760, %v5745_v22 }
 0x173   :  { %v5865_v1 = vsub.f32 %v5653_v62, %v7101_v43  ;;  %v5881_v20 = vsub.f32 %v5680_v12, %v7104_v36  ;;  %v7105_v62 = vand.u32 4294901760, %v5682_v18  ;;  %v7108_v12 = vand.u32 4294901760, %v5697_v41 }
 0x174   :  { %v5933_v59 = vsub.f32 %v5745_v22, %v7114_v13  ;;  %v7119_v22 = vand.u32 4294901760, %v5783_v49 }
 0x175   :  { %v5886_v43 = vsub.f32 %v5682_v18, %v7105_v62  ;;  %v5902_v36 = vsub.f32 %v5697_v41, %v7108_v12  ;;  %v7109_v18 = vand.u32 4294901760, %v5707_v45  ;;  %v7112_v41 = vand.u32 4294901760, %v5741_v11 }
 0x176   :  { %v5958_v29 = vsub.f32 %v5783_v49, %v7119_v22  ;;  %v5978_v49 = vsub.f32 %v1647_v24, %v1708_v31  ;;  %v1657_v22 = vld [vmem:[#allocation7 + $0x158] sm:$0xff]  ;;  %v5993_v31 = vsub.f32 %v1653_v23, %v1716_v51  ;;  %v5997_v24 = vsub.f32 %v1652_v10, %v2554_v21 }
 0x177   :  { %v5907_v62 = vsub.f32 %v5707_v45, %v7109_v18  ;;  %v5923_v12 = vsub.f32 %v5741_v11, %v7112_v41  ;;  %v7113_v45 = vand.u32 4294901760, %v5743_v47  ;;  %v5943_v11 = vsub.f32 %v5767_v50, %v7116_v55 }
 0x178   :  { %v7117_v41 = vand.u32 4294901760, %v5769_v28  ;;  %7120 = vst [vmem:[#allocation29_spill] sm:$0xff] %v5958_v29  ;;  %v5963_v50 = vsub.f32 %v5785_v46, %v7121_v40  ;;  %v7122_v55 = vand.u32 4294901760, %v5789_v48  ;;  %v1656_v29 = vld [vmem:[#allocation7 + $0x150] sm:$0xff]  ;;  %v5981_v46 = vsub.f32 %v5821_v6, %v2548_v56  ;;  %7125 = vst [vmem:[#allocation32_spill] sm:$0xff] %v5993_v31 }
 0x179   :  { %v5928_v18 = vsub.f32 %v5743_v47, %v7113_v45  ;;  %v7118_v45 = vand.u32 4294901760, %v5781_v9  ;;  %v5983_v40 = vsub.f32 %v1649_v35, %v2551_v19  ;;  %7127 = vst [vmem:[#allocation35_spill] sm:$0xff] %v5997_v24  ;;  %v5999_v56 = vsub.f32 %v1655_v61, %v2557_v39 }
 0x17a   :  { %v5948_v47 = vsub.f32 %v5769_v28, %v7117_v41  ;;  %v5968_v28 = vsub.f32 %v5789_v48, %v7122_v55  ;;  %v5971_v41 = vsub.f32 %v5807_v8, %v1702_v33  ;;  %v5985_v48 = vsub.f32 %v1651_v57, %v1710_v17  ;;  %v1659_v8 = vld [vmem:[#allocation7 + $0x168] sm:$0xff]  ;;  %v1658_v33 = vld [vmem:[#allocation7 + $0x160] sm:$0xff] }
 0x17b   :  { %v5953_v13 = vsub.f32 %v5781_v9, %v7118_v45  ;;  %v5974_v9 = vsub.f32 %v5809_v15, %v1706_v27  ;;  %v5976_v45 = vsub.f32 %v1644_v32, %v1704_v58  ;;  %v5987_v55 = vsub.f32 %v1654_v34, %v1714_v14  ;;  %v1661_v27 = vld [vmem:[#allocation7 + $0x178] sm:$0xff]  ;;  %7128 = vst [vmem:[#allocation36_spill] sm:$0xff] %v5999_v56 }
 0x17c   :  { %v5989_v15 = vpack.c.bf16 %v1716_v51, %v1712_v53  ;;  %v5991_v58 = vsub.f32 %v1650_v52, %v1712_v53  ;;  %v5995_v32 = vpack.c.bf16 %v2557_v39, %v2554_v21  ;;  %v1718_v19 = vand.u32 4294901760, %v1657_v22 }
 0x17d   :  { %v1722_v35 = vand.u32 4294901760, %v1660_v2  ;;  %v1720_v34 = vand.u32 4294901760, %v1656_v29  ;;  %v1724_v6 = vand.u32 4294901760, %v1659_v8  ;;  %v2560_v57 = vand.u32 4294901760, %v1658_v33 }
 0x17e   :  { %7123 = vst [vmem:[#allocation30_spill] sm:$0xff] %v5989_v15  ;;  %7124 = vst [vmem:[#allocation31_spill] sm:$0xff] %v5991_v58  ;;  %4379 = vmatpush1.bf16.msra.mxu1 %v5989_v15  ;;  %4564 = vmatpush3.bf16.msra.mxu0 %v5995_v32  ;;  %v2563_v14 = vand.u32 4294901760, %v1661_v27  ;;  %v6005_v51 = vsub.f32 %v1657_v22, %v1718_v19  ;;  %v6851_v39 = vand.u32 4294901760, %v5837_v42 }
 0x17f   :  { %7126 = vst [vmem:[#allocation33_spill] sm:$0xff] %v5995_v32  ;;  %v6003_v52 = vpack.c.bf16 %v1722_v35, %v1718_v19  ;;  %v6007_v23 = vsub.f32 %v1660_v2, %v1722_v35  ;;  %4565 = vmatprep.subr.bf16.mxu0 %v6945_v44  ;;  %v6011_v61 = vpack.c.bf16 %v1724_v6, %v1720_v34  ;;  %v6861_v35 = vand.u32 4294901760, %v5660_v0 }
 0x180   :  { %7130 = vst [vmem:[#allocation40_spill] sm:$0xff] %v6005_v51  ;;  %v6013_v10 = vsub.f32 %v1656_v29, %v1720_v34  ;;  %v6015_v17 = vsub.f32 %v1659_v8, %v1724_v6  ;;  %v6017_v32 = vpack.c.bf16 %v2563_v14, %v2560_v57  ;;  %v6020_v22 = vsub.f32 %v1658_v33, %v2560_v57  ;;  %v7133_v33 = vld [vmem:[#allocation49_spill] sm:$0xff] }
 0x181   :  { %7129 = vst [vmem:[#allocation37_spill] sm:$0xff] %v6003_v52  ;;  %7131 = vst [vmem:[#allocation42_spill] sm:$0xff] %v6011_v61  ;;  %4381 = vmatprep.subr.bf16.mxu1 %v6003_v52  ;;  %v6022_v2 = vsub.f32 %v1661_v27, %v2563_v14  ;;  %v1773_v19 = vsub.f32 %v5837_v42, %v6851_v39  ;;  %v6852_v29 = vand.u32 4294901760, %v5842_v54  ;;  %v6855_v8 = vand.u32 4294901760, %v5658_v60  ;;  %v7134_v57 = vld [vmem:[#allocation41_spill] sm:$0xff] }
 0x182   :  { %7132 = vst [vmem:[#allocation44_spill] sm:$0xff] %v6017_v32  ;;  %4383 = vmatpush1.bf16.msra.mxu1 %v6011_v61  ;;  %4567 = vmatpush3.bf16.msra.mxu0 %v6017_v32  ;;  %v6866_v34 = vand.u32 4294901760, %v5662_v3  ;;  %v6867_v14 = vand.u32 4294901760, %v7134_v57  ;;  %v6876_v32 = vand.u32 4294901760, %v5855_v63 }
 0x183   :  { %v1774_v27 = vand.u32 4294901760, %v1773_v19  ;;  %4568 = vmatprep.subr.bf16.mxu0 %v6945_v44  ;;  %v1779_v39 = vsub.f32 %v5658_v60, %v6855_v8  ;;  %v6875_v8 = vand.u32 4294901760, %v5860_v4 }
 0x184   :  { %v2612_v19 = vsub.f32 %v5662_v3, %v6866_v34  ;;  %v1809_v34 = vsub.f32 %v5855_v63, %v6876_v32 }
 0x185   :  { %v1780_v52 = vand.u32 4294901760, %v1779_v39 }
 0x186   :  { %v3284_v53 = vpop.f32.mrb[4].mxu1 }
 0x187   :  { %v3285_v21 = vpop.f32.mrb[5].mxu1 }
 0x188   :  { %v3286_v15 = vadd.f32 %v3285_v21, %v3284_v53  ;;  %v6869_v53 = vand.u32 4294901760, %v5850_v5  ;;  %v1785_v21 = vsub.f32 %v5842_v54, %v6852_v29 }
 0x18a   :  { %v6034_v6 = vadd.f32 %v3286_v15, %v7133_v33  ;;  %v1791_v15 = vsub.f32 %v5660_v0, %v6861_v35  ;;  %v2619_v33 = vsub.f32 %v7134_v57, %v6867_v14  ;;  %v1797_v29 = vsub.f32 %v5850_v5, %v6869_v53 }
 0x18b   :  { %v1786_v61 = vand.u32 4294901760, %v1785_v21  ;;  %v2613_v35 = vand.u32 4294901760, %v2612_v19  ;;  %v1803_v14 = vsub.f32 %v5860_v4, %v6875_v8  ;;  %v6873_v5 = vand.u32 4294901760, %v5865_v1 }
 0x18c   :  { %v1792_v44 = vand.u32 4294901760, %v1791_v15  ;;  %v2620_v0 = vand.u32 4294901760, %v2619_v33  ;;  %v1798_v60 = vand.u32 4294901760, %v1797_v29  ;;  %v6872_v21 = vand.u32 4294901760, %v5871_v37 }
 0x18d   :  { %v4384_v57 = vpack.c.bf16 %v1786_v61, %v1774_v27  ;;  %v1810_v15 = vand.u32 4294901760, %v1809_v34  ;;  %v1804_v19 = vand.u32 4294901760, %v1803_v14  ;;  %v6874_v29 = vand.u32 4294901760, %v5876_v26 }
 0x18e   :  { %v6065_v53 = vpack.c.bf16 %v1792_v44, %v1780_v52  ;;  %v6069_v39 = vpack.c.bf16 %v2620_v0, %v2613_v35  ;;  %v1815_v33 = vsub.f32 %v5865_v1, %v6873_v5  ;;  %v2626_v44 = vsub.f32 %v5871_v37, %v6872_v21 }
 0x18f   :  { %4385 = vmatprep.subr.bf16.mxu1 %v4384_v57  ;;  %v6877_v52 = vand.u32 4294901760, %v5881_v20  ;;  %v6878_v61 = vand.u32 4294901760, %v5886_v43  ;;  %v6080_v27 = vpack.c.bf16 %v1810_v15, %v1798_v60  ;;  %v2633_v0 = vsub.f32 %v5876_v26, %v6874_v29 }
 0x190   :  { %7135 = vst [vmem:[#allocation47_spill] sm:$0xff] %v6065_v53  ;;  %7136 = vst [vmem:[#allocation51_spill] sm:$0xff] %v6069_v39  ;;  %v6879_v35 = vand.u32 4294901760, %v5892_v25  ;;  %v6880_v34 = vand.u32 4294901760, %v5897_v38  ;;  %v1816_v57 = vand.u32 4294901760, %v1815_v33  ;;  %v2627_v14 = vand.u32 4294901760, %v2626_v44 }
 0x191   :  { %7137 = vst [vmem:[#allocation34_spill] sm:$0xff] %v6080_v27  ;;  %v1821_v21 = vsub.f32 %v5881_v20, %v6877_v52  ;;  %v1833_v5 = vsub.f32 %v5886_v43, %v6878_v61  ;;  %v2634_v60 = vand.u32 4294901760, %v2633_v0  ;;  %v6883_v33 = vand.u32 4294901760, %v5902_v36 }
 0x192   :  { %v1827_v15 = vsub.f32 %v5892_v25, %v6879_v35  ;;  %v1839_v29 = vsub.f32 %v5897_v38, %v6880_v34  ;;  %v6100_v44 = vpack.c.bf16 %v1816_v57, %v1804_v19  ;;  %v6881_v52 = vand.u32 4294901760, %v5907_v62 }
 0x193   :  { %v1822_v8 = vand.u32 4294901760, %v1821_v21  ;;  %v1834_v32 = vand.u32 4294901760, %v1833_v5  ;;  %v6103_v27 = vpack.c.bf16 %v2634_v60, %v2627_v14  ;;  %v2640_v35 = vsub.f32 %v5902_v36, %v6883_v33 }
 0x194   :  { %7138 = vst [vmem:[#allocation38_spill] sm:$0xff] %v6100_v44  ;;  %v1828_v61 = vand.u32 4294901760, %v1827_v15  ;;  %v1840_v0 = vand.u32 4294901760, %v1839_v29  ;;  %v2647_v34 = vsub.f32 %v5907_v62, %v6881_v52  ;;  %v6882_v19 = vand.u32 4294901760, %v5913_v7 }
 0x195   :  { %7139 = vst [vmem:[#allocation39_spill] sm:$0xff] %v6103_v27  ;;  %v6108_v39 = vpack.c.bf16 %v1834_v32, %v1822_v8  ;;  %v6884_v5 = vand.u32 4294901760, %v5918_v30  ;;  %v2641_v57 = vand.u32 4294901760, %v2640_v35  ;;  %v6885_v14 = vand.u32 4294901760, %v5923_v12 }
 0x196   :  { %v6115_v21 = vpack.c.bf16 %v1840_v0, %v1828_v61  ;;  %v6886_v29 = vand.u32 4294901760, %v5928_v18  ;;  %v2648_v60 = vand.u32 4294901760, %v2647_v34  ;;  %v1845_v32 = vsub.f32 %v5913_v7, %v6882_v19 }
 0x197   :  { %7140 = vst [vmem:[#allocation52_spill] sm:$0xff] %v6108_v39  ;;  %v1857_v8 = vsub.f32 %v5918_v30, %v6884_v5  ;;  %v6887_v15 = vand.u32 4294901760, %v5933_v59  ;;  %v1851_v61 = vsub.f32 %v5923_v12, %v6885_v14  ;;  %v6888_v34 = vand.u32 4294901760, %v5938_v16 }
 0x198   :  { %7141 = vst [vmem:[#allocation48_spill] sm:$0xff] %v6115_v21  ;;  %v1863_v35 = vsub.f32 %v5928_v18, %v6886_v29  ;;  %v6889_v0 = vand.u32 4294901760, %v5943_v11  ;;  %v6134_v52 = vpack.c.bf16 %v2648_v60, %v2641_v57  ;;  %v1846_v19 = vand.u32 4294901760, %v1845_v32 }
 0x199   :  { %v1858_v33 = vand.u32 4294901760, %v1857_v8  ;;  %v2654_v5 = vsub.f32 %v5933_v59, %v6887_v15  ;;  %v1852_v21 = vand.u32 4294901760, %v1851_v61  ;;  %v2661_v14 = vsub.f32 %v5938_v16, %v6888_v34 }
 0x19a   :  { %7142 = vst [vmem:[#allocation49_spill] sm:$0xff] %v6134_v52  ;;  %v1864_v39 = vand.u32 4294901760, %v1863_v35  ;;  %v1869_v29 = vsub.f32 %v5943_v11, %v6889_v0  ;;  %v6890_v60 = vand.u32 4294901760, %v5948_v47  ;;  %v6891_v32 = vand.u32 4294901760, %v5953_v13  ;;  %v7145_v35 = vld [vmem:[#allocation29_spill] sm:$0xff] }
 0x19b   :  { %v6145_v27 = vpack.c.bf16 %v1858_v33, %v1846_v19  ;;  %v2655_v57 = vand.u32 4294901760, %v2654_v5  ;;  %v2662_v15 = vand.u32 4294901760, %v2661_v14  ;;  %v6892_v52 = vand.u32 4294901760, %v7145_v35 }
 0x19c   :  { %v6149_v8 = vpack.c.bf16 %v1864_v39, %v1852_v21  ;;  %v1870_v61 = vand.u32 4294901760, %v1869_v29  ;;  %v1881_v34 = vsub.f32 %v5948_v47, %v6890_v60  ;;  %v1875_v33 = vsub.f32 %v5953_v13, %v6891_v32 }
 0x19d   :  { %7143 = vst [vmem:[#allocation54_spill] sm:$0xff] %v6145_v27  ;;  %v6893_v19 = vand.u32 4294901760, %v5963_v50  ;;  %v6894_v5 = vand.u32 4294901760, %v5968_v28  ;;  %v6160_v0 = vpack.c.bf16 %v2662_v15, %v2655_v57  ;;  %v1887_v39 = vsub.f32 %v7145_v35, %v6892_v52 }
 0x19e   :  { %7144 = vst [vmem:[#allocation55_spill] sm:$0xff] %v6149_v8  ;;  %v6895_v21 = vand.u32 4294901760, %v5971_v41  ;;  %v6896_v14 = vand.u32 4294901760, %v5974_v9  ;;  %v1882_v29 = vand.u32 4294901760, %v1881_v34  ;;  %v1876_v60 = vand.u32 4294901760, %v1875_v33 }
 0x19f   :  { %7146 = vst [vmem:[#allocation29_spill] sm:$0xff] %v6160_v0  ;;  %v2668_v32 = vsub.f32 %v5963_v50, %v6893_v19  ;;  %v2675_v8 = vsub.f32 %v5968_v28, %v6894_v5  ;;  %v1888_v15 = vand.u32 4294901760, %v1887_v39  ;;  %v6897_v34 = vand.u32 4294901760, %v5976_v45 }
 0x1a0   :  { %v1893_v57 = vsub.f32 %v5971_v41, %v6895_v21  ;;  %v1905_v52 = vsub.f32 %v5974_v9, %v6896_v14  ;;  %v6180_v33 = vpack.c.bf16 %v1882_v29, %v1870_v61  ;;  %v6898_v19 = vand.u32 4294901760, %v5978_v49 }
 0x1a1   :  { %v2669_v0 = vand.u32 4294901760, %v2668_v32  ;;  %v2676_v27 = vand.u32 4294901760, %v2675_v8  ;;  %v6183_v44 = vpack.c.bf16 %v1888_v15, %v1876_v60  ;;  %v1899_v21 = vsub.f32 %v5976_v45, %v6897_v34 }
 0x1a2   :  { %7147 = vst [vmem:[#allocation56_spill] sm:$0xff] %v6180_v33  ;;  %v1894_v5 = vand.u32 4294901760, %v1893_v57  ;;  %v1906_v39 = vand.u32 4294901760, %v1905_v52  ;;  %v1911_v14 = vsub.f32 %v5978_v49, %v6898_v19  ;;  %v6899_v61 = vand.u32 4294901760, %v5981_v46 }
 0x1a3   :  { %7148 = vst [vmem:[#allocation57_spill] sm:$0xff] %v6183_v44  ;;  %v6188_v53 = vpack.c.bf16 %v2676_v27, %v2669_v0  ;;  %v6900_v32 = vand.u32 4294901760, %v5983_v40  ;;  %v1900_v60 = vand.u32 4294901760, %v1899_v21  ;;  %v6901_v52 = vand.u32 4294901760, %v5985_v48 }
 0x1a4   :  { %v6195_v29 = vpack.c.bf16 %v1906_v39, %v1894_v5  ;;  %v6902_v15 = vand.u32 4294901760, %v5987_v55  ;;  %v1912_v34 = vand.u32 4294901760, %v1911_v14  ;;  %v2682_v27 = vsub.f32 %v5981_v46, %v6899_v61 }
 0x1a5   :  { %7149 = vst [vmem:[#allocation58_spill] sm:$0xff] %v6188_v53  ;;  %v2689_v0 = vsub.f32 %v5983_v40, %v6900_v32  ;;  %v6903_v19 = vand.u32 4294901760, %v5991_v58  ;;  %v1917_v5 = vsub.f32 %v5985_v48, %v6901_v52  ;;  %v6906_v14 = vand.u32 4294901760, %v5993_v31 }
 0x1a6   :  { %v3319_v8 = vpop.f32.mrb[6].mxu1  ;;  %7150 = vst [vmem:[#allocation59_spill] sm:$0xff] %v6195_v29  ;;  %v1929_v21 = vsub.f32 %v5987_v55, %v6902_v15  ;;  %v6213_v39 = vpack.c.bf16 %v1912_v34, %v1900_v60  ;;  %v2683_v61 = vand.u32 4294901760, %v2682_v27  ;;  %v6904_v34 = vand.u32 4294901760, %v5997_v24 }
 0x1a7   :  { %v3320_v57 = vpop.f32.mrb[7].mxu1  ;;  %v2690_v29 = vand.u32 4294901760, %v2689_v0  ;;  %v1923_v32 = vsub.f32 %v5991_v58, %v6903_v19  ;;  %v1935_v52 = vsub.f32 %v5993_v31, %v6906_v14  ;;  %v6905_v60 = vand.u32 4294901760, %v5999_v56 }
 0x1a8   :  { %v3321_v53 = vadd.f32 %v3320_v57, %v3319_v8  ;;  %7151 = vst [vmem:[#allocation60_spill] sm:$0xff] %v6213_v39  ;;  %v1918_v57 = vand.u32 4294901760, %v1917_v5  ;;  %v1930_v44 = vand.u32 4294901760, %v1929_v21  ;;  %v6907_v19 = vand.u32 4294901760, %v6005_v51 }
 0x1a9   :  { %v6224_v15 = vpack.c.bf16 %v2690_v29, %v2683_v61  ;;  %v1924_v33 = vand.u32 4294901760, %v1923_v32  ;;  %v1936_v0 = vand.u32 4294901760, %v1935_v52  ;;  %v2703_v61 = vsub.f32 %v5999_v56, %v6905_v60 }
 0x1aa   :  { %v6219_v8 = vadd.f32 %v3321_v53, %v6034_v6  ;;  %v6228_v27 = vpack.c.bf16 %v1930_v44, %v1918_v57  ;;  %v6908_v6 = vand.u32 4294901760, %v6007_v23  ;;  %v2696_v53 = vsub.f32 %v5997_v24, %v6904_v34 }
 0x1ab   :  { %7152 = vst [vmem:[#allocation61_spill] sm:$0xff] %v6224_v15  ;;  %v6909_v32 = vand.u32 4294901760, %v6013_v10  ;;  %v6910_v29 = vand.u32 4294901760, %v6015_v17  ;;  %v6240_v5 = vpack.c.bf16 %v1936_v0, %v1924_v33  ;;  %v1941_v44 = vsub.f32 %v6005_v51, %v6907_v19 }
 0x1ac   :  { %7153 = vst [vmem:[#allocation62_spill] sm:$0xff] %v6228_v27  ;;  %v1953_v52 = vsub.f32 %v6007_v23, %v6908_v6  ;;  %v6911_v21 = vand.u32 4294901760, %v6020_v22  ;;  %v2697_v57 = vand.u32 4294901760, %v2696_v53  ;;  %v2704_v34 = vand.u32 4294901760, %v2703_v61 }
 0x1ad   :  { %7154 = vst [vmem:[#allocation63_spill] sm:$0xff] %v6240_v5  ;;  %v1947_v60 = vsub.f32 %v6013_v10, %v6909_v32  ;;  %v1959_v33 = vsub.f32 %v6015_v17, %v6910_v29  ;;  %v1942_v0 = vand.u32 4294901760, %v1941_v44  ;;  %v6912_v6 = vand.u32 4294901760, %v6022_v2  ;;  %v7156_v29 = vld [vmem:[#allocation19_spill] sm:$0xff] }
 0x1ae   :  { %v1954_v14 = vand.u32 4294901760, %v1953_v52  ;;  %v2710_v19 = vsub.f32 %v6020_v22, %v6911_v21  ;;  %v6259_v5 = vpack.c.bf16 %v2704_v34, %v2697_v57  ;;  %v7155_v52 = vld [vmem:[#allocation17_spill] sm:$0xff] }
 0x1af   :  { %v1948_v53 = vand.u32 4294901760, %v1947_v60  ;;  %v1960_v61 = vand.u32 4294901760, %v1959_v33  ;;  %v2717_v44 = vsub.f32 %v6022_v2, %v6912_v6  ;;  %v7157_v34 = vld [vmem:[#allocation41_spill] sm:$0xff]  ;;  %v7158_v60 = vld [vmem:[#allocation28_spill] sm:$0xff] }
 0x1b0   :  { %v6263_v32 = vpack.c.bf16 %v1954_v14, %v1942_v0  ;;  %v2711_v15 = vand.u32 4294901760, %v2710_v19 }
 0x1b1   :  { %v6270_v21 = vpack.c.bf16 %v1960_v61, %v1948_v53  ;;  %v2718_v0 = vand.u32 4294901760, %v2717_v44 }
 0x1b3   :  { %v6292_v14 = vpack.c.bf16 %v2718_v0, %v2711_v15 }
 0x1c6   :  { %v3354_v6 = vpop.f32.mrb[8].mxu1 }
 0x1c7   :  { %v3355_v44 = vpop.f32.mrb[9].mxu1 }
 0x1c8   :  { %v3356_v19 = vadd.f32 %v3355_v44, %v3354_v6  ;;  %v7168_v44 = vld [vmem:[#allocation49_spill] sm:$0xff] }
 0x1ca   :  { %v864_v15 = vadd.f32 %v3356_v19, %v6219_v8  ;;  %v7165_v19 = vld [vmem:[#allocation39_spill] sm:$0xff] }
 0x1e3   :  { %v1608_v39 = vpop.f32.mrb[0].mxu0 }
 0x1e4   :  { %v3805_v0 = vpop.f32.mrb[1].mxu0 }
 0x1e5   :  { %v7170_v0 = vld [vmem:[#allocation55_spill] sm:$0xff] }
 0x1e6   :  { %v3389_v27 = vpop.f32.mrb[10].mxu1 }
 0x1e7   :  { %v3390_v58 = vpop.f32.mrb[11].mxu1 }
 0x1e8   :  { %v3391_v31 = vadd.f32 %v3390_v58, %v3389_v27  ;;  %v7159_v58 = vld [vmem:[#allocation47_spill] sm:$0xff]  ;;  %v7164_v27 = vld [vmem:[#allocation38_spill] sm:$0xff] }
 0x1ea   :  { %v968_v53 = vadd.f32 %v3391_v31, %v864_v15  ;;  %v7160_v31 = vld [vmem:[#allocation51_spill] sm:$0xff]  ;;  %v7169_v15 = vld [vmem:[#allocation54_spill] sm:$0xff] }
 0x1ec   :  { %v4688_v24 = vadd.f32 %v1608_v39, %v968_v53  ;;  %v7163_v39 = vmov 0.0   ;;  %v7166_v53 = vld [vmem:[#allocation52_spill] sm:$0xff] }
 0x1ee   :  { %v1612_v56 = vmax.f32 %v4688_v24, 1e-16  ;;  %v7161_v24 = vld [vmem:[#allocation34_spill] sm:$0xff] }
 0x1f0   :  { %4730 = vrsqrt.f32 %v1612_v56  ;;  %v7162_v56 = vmov 0.0|0.0  }
 0x1fa   :  { %v4731_v61 = vpop.eup %4730 }
 0x1fb   :  { %v6319_v51 = vand.u32 4294901760, %v4731_v61 }
 0x1fd   :  { %v6322_v57 = vsub.f32 %v4731_v61, %v6319_v51  ;;  %v7167_v61 = vld [vmem:[#allocation48_spill] sm:$0xff] }
 0x1ff   :  { %v6325_v33 = vand.u32 4294901760, %v6322_v57 }
 0x201   :  { %v1762_v8 = vsub.f32 %v6322_v57, %v6325_v33 }
 0x203   :  { %v1763_v6 = vand.u32 4294901760, %v1762_v8  ;;  %v7171_v8 = vld [vmem:[#allocation29_spill] sm:$0xff] }
 0x205   :  { %1764 = vmatmul.mubr.f32.vlgmr.msra.gmra.mrb[12].mxu1 %v1763_v6  ;;  %3839 = vmatmul.mubr.f32.vlgmr.msra.gmra.mrb[2].mxu0 %v1763_v6  ;;  %v7172_v6 = vld [vmem:[#allocation56_spill] sm:$0xff] }
 0x206   :  { %4387 = vmatpush1.bf16.msra.mxu1 %v7159_v58  ;;  %4570 = vmatpush3.bf16.msra.mxu0 %v7160_v31  ;;  %v7173_v58 = vld [vmem:[#allocation57_spill] sm:$0xff]  ;;  %v7174_v31 = vld [vmem:[#allocation58_spill] sm:$0xff] }
 0x207   :  { %4389 = vmatprep.subr.bf16.mxu1 %v7161_v24  ;;  %4571 = vmatprep.subr.bf16.mxu0 %v7162_v56  ;;  %v7175_v24 = vld [vmem:[#allocation59_spill] sm:$0xff] }
 0x208   :  { %1994 = vmatprep.mubr.f32.mxu1 %v7163_v39  ;;  %3873 = vmatprep.mubr.msk.f32.mxu0 %vm4836_vm0, %v7163_v39 }
 0x20a   :  { %4391 = vmatpush1.bf16.msra.mxu1 %v7164_v27  ;;  %4573 = vmatpush3.bf16.msra.mxu0 %v7165_v19  ;;  %v7176_v27 = vld [vmem:[#allocation60_spill] sm:$0xff]  ;;  %v7177_v19 = vld [vmem:[#allocation61_spill] sm:$0xff] }
 0x20b   :  { %4393 = vmatprep.subr.bf16.mxu1 %v7166_v53  ;;  %4574 = vmatprep.subr.bf16.mxu0 %v7162_v56  ;;  %v7178_v53 = vld [vmem:[#allocation62_spill] sm:$0xff] }
 0x20e   :  { %4395 = vmatpush1.bf16.msra.mxu1 %v7167_v61  ;;  %4576 = vmatpush3.bf16.msra.mxu0 %v7168_v44  ;;  %v7179_v61 = vld [vmem:[#allocation63_spill] sm:$0xff]  ;;  %v7180_v44 = vpack.c.bf16 %v5842_v54, %v5837_v42 }
 0x20f   :  { %4397 = vmatprep.subr.bf16.mxu1 %v7169_v15  ;;  %4577 = vmatprep.subr.bf16.mxu0 %v7162_v56  ;;  %v7185_v15 = vpack.c.bf16 %v5876_v26, %v5871_v37 }
 0x212   :  { %4399 = vmatpush1.bf16.msra.mxu1 %v7170_v0  ;;  %4579 = vmatpush3.bf16.msra.mxu0 %v7171_v8  ;;  %v7186_v0 = vpack.c.bf16 %v5886_v43, %v5881_v20  ;;  %v7187_v8 = vpack.c.bf16 %v5897_v38, %v5892_v25 }
 0x213   :  { %4401 = vmatprep.subr.bf16.mxu1 %v7172_v6  ;;  %4580 = vmatprep.subr.bf16.mxu0 %v7162_v56  ;;  %v7188_v6 = vpack.c.bf16 %v5907_v62, %v5902_v36 }
 0x216   :  { %4403 = vmatpush1.bf16.msra.mxu1 %v7173_v58  ;;  %4582 = vmatpush3.bf16.msra.mxu0 %v7174_v31  ;;  %v7189_v58 = vpack.c.bf16 %v5918_v30, %v5913_v7  ;;  %v7190_v31 = vpack.c.bf16 %v5928_v18, %v5923_v12 }
 0x217   :  { %4405 = vmatprep.subr.bf16.mxu1 %v7175_v24  ;;  %4583 = vmatprep.subr.bf16.mxu0 %v7162_v56  ;;  %v7191_v24 = vpack.c.bf16 %v5938_v16, %v5933_v59 }
 0x21a   :  { %4407 = vmatpush1.bf16.msra.mxu1 %v7176_v27  ;;  %4585 = vmatpush3.bf16.msra.mxu0 %v7177_v19  ;;  %v7192_v27 = vpack.c.bf16 %v5948_v47, %v5943_v11  ;;  %v7193_v19 = vpack.c.bf16 %v7145_v35, %v5953_v13 }
 0x21b   :  { %4409 = vmatprep.subr.bf16.mxu1 %v7178_v53  ;;  %4586 = vmatprep.subr.bf16.mxu0 %v7162_v56  ;;  %v7194_v53 = vpack.c.bf16 %v5968_v28, %v5963_v50 }
 0x21e   :  { %4411 = vmatpush1.bf16.msra.mxu1 %v7179_v61  ;;  %4588 = vmatpush3.bf16.msra.mxu0 %v6259_v5  ;;  %v7181_v5 = vpack.c.bf16 %v7156_v29, %v7155_v52  ;;  %v7195_v61 = vpack.c.bf16 %v5974_v9, %v5971_v41 }
 0x21f   :  { %4413 = vmatprep.subr.bf16.mxu1 %v6263_v32  ;;  %4589 = vmatprep.subr.bf16.mxu0 %v7162_v56  ;;  %v7182_v32 = vpack.c.bf16 %v7157_v34, %v5662_v3 }
 0x222   :  { %4415 = vmatpush1.bf16.msra.mxu1 %v6270_v21  ;;  %4591 = vmatpush3.bf16.msra.mxu0 %v6292_v14  ;;  %v7183_v21 = vpack.c.bf16 %v5855_v63, %v7158_v60  ;;  %v7184_v14 = vpack.c.bf16 %v5865_v1, %v5860_v4 }
 0x223   :  { %4417 = vmatprep.subr.bf16.mxu1 %v7180_v44  ;;  %4592 = vmatprep.subr.bf16.mxu0 %v7162_v56  ;;  %v7196_v44 = vpack.c.bf16 %v5978_v49, %v5976_v45 }
 0x225   :  { %1996 = vmatmul.mubr.f32.vlgmr.msra.gmra.mrb[12].mxu1 %v6319_v51  ;;  %3874 = vmatmul.mubr.f32.vlgmr.msra.gmra.mrb[2].mxu0 %v6319_v51 }
 0x226   :  { %4419 = vmatpush1.bf16.msra.mxu1 %v7181_v5  ;;  %4594 = vmatpush3.bf16.msra.mxu0 %v7182_v32  ;;  %v7197_v5 = vpack.c.bf16 %v5983_v40, %v5981_v46  ;;  %v7198_v32 = vpack.c.bf16 %v5987_v55, %v5985_v48 }
 0x227   :  { %4421 = vmatprep.subr.bf16.mxu1 %v7183_v21  ;;  %4595 = vmatprep.subr.bf16.mxu0 %v7162_v56  ;;  %v7199_v21 = vld [vmem:[#allocation32_spill] sm:$0xff] }
 0x228   :  { %2130 = vmatprep.mubr.f32.mxu1 %v7163_v39  ;;  %3908 = vmatprep.mubr.msk.f32.mxu0 %vm4836_vm0, %v7163_v39 }
 0x22a   :  { %4423 = vmatpush1.bf16.msra.mxu1 %v7184_v14  ;;  %4597 = vmatpush3.bf16.msra.mxu0 %v7185_v15  ;;  %v7200_v14 = vld [vmem:[#allocation31_spill] sm:$0xff] }
 0x22b   :  { %4425 = vmatprep.subr.bf16.mxu1 %v7186_v0  ;;  %4598 = vmatprep.subr.bf16.mxu0 %v7162_v56  ;;  %v7201_v15 = vpack.c.bf16 %v7199_v21, %v7200_v14  ;;  %v7202_v0 = vld [vmem:[#allocation36_spill] sm:$0xff] }
 0x22e   :  { %4427 = vmatpush1.bf16.msra.mxu1 %v7187_v8  ;;  %4600 = vmatpush3.bf16.msra.mxu0 %v7188_v6  ;;  %v7203_v8 = vld [vmem:[#allocation35_spill] sm:$0xff] }
 0x22f   :  { %4429 = vmatprep.subr.bf16.mxu1 %v7189_v58  ;;  %4601 = vmatprep.subr.bf16.mxu0 %v7162_v56  ;;  %v7204_v6 = vpack.c.bf16 %v7202_v0, %v7203_v8  ;;  %v7205_v58 = vld [vmem:[#allocation40_spill] sm:$0xff] }
 0x232   :  { %4431 = vmatpush1.bf16.msra.mxu1 %v7190_v31  ;;  %4603 = vmatpush3.bf16.msra.mxu0 %v7191_v24  ;;  %v7206_v31 = vpack.c.bf16 %v6007_v23, %v7205_v58  ;;  %v7207_v24 = vpack.c.bf16 %v6015_v17, %v6013_v10 }
 0x233   :  { %4433 = vmatprep.subr.bf16.mxu1 %v7192_v27  ;;  %4604 = vmatprep.subr.bf16.mxu0 %v7162_v56  ;;  %v7208_v27 = vpack.c.bf16 %v6022_v2, %v6020_v22 }
 0x236   :  { %4435 = vmatpush1.bf16.msra.mxu1 %v7193_v19  ;;  %4606 = vmatpush3.bf16.msra.mxu0 %v7194_v53  ;;  %v7209_v19 = vld [vmem:[#allocation13_spill] sm:$0xff]  ;;  %v7210_v53 = vld [vmem:[#allocation14_spill] sm:$0xff] }
 0x237   :  { %4437 = vmatprep.subr.bf16.mxu1 %v7195_v61  ;;  %4607 = vmatprep.subr.bf16.mxu0 %v7162_v56  ;;  %v7211_v61 = vld [vmem:[#allocation15_spill] sm:$0xff] }
 0x23a   :  { %4439 = vmatpush1.bf16.msra.mxu1 %v7196_v44  ;;  %4609 = vmatpush3.bf16.msra.mxu0 %v7197_v5  ;;  %v7212_v44 = vld [vmem:[#allocation43_spill] sm:$0xff]  ;;  %v7213_v5 = vld [vmem:[#allocation45_spill] sm:$0xff] }
 0x23b   :  { %4441 = vmatprep.subr.bf16.mxu1 %v7198_v32  ;;  %4610 = vmatprep.subr.bf16.mxu0 %v7162_v56  ;;  %v7214_v32 = vld [vmem:[#allocation46_spill] sm:$0xff] }
 0x23e   :  { %4443 = vmatpush1.bf16.msra.mxu1 %v7201_v15  ;;  %4612 = vmatpush3.bf16.msra.mxu0 %v7204_v6  ;;  %v7215_v15 = vld [vmem:[#allocation12_spill] sm:$0xff]  ;;  %v7217_v6 = vld [vmem:[#allocation50_spill] sm:$0xff] }
 0x23f   :  { %4445 = vmatprep.subr.bf16.mxu1 %v7206_v31  ;;  %4613 = vmatprep.subr.bf16.mxu0 %v7162_v56  ;;  %v7218_v31 = vld [vmem:[#allocation16_spill] sm:$0xff] }
 0x242   :  { %4447 = vmatpush1.bf16.msra.mxu1 %v7207_v24  ;;  %4615 = vmatpush3.bf16.msra.mxu0 %v7208_v27  ;;  %v7219_v24 = vld [vmem:[#allocation18_spill] sm:$0xff]  ;;  %v7220_v27 = vld [vmem:[#allocation20_spill] sm:$0xff] }
 0x243   :  { %4449 = vmatprep.subr.bf16.mxu1 %v7209_v19  ;;  %4616 = vmatprep.subr.bf16.mxu0 %v7162_v56 }
 0x245   :  { %2133 = vmatmul.mubr.f32.vlgmr.msra.gmra.mrb[12].mxu1 %v6322_v57  ;;  %3909 = vmatmul.mubr.f32.vlgmr.msra.gmra.mrb[2].mxu0 %v6322_v57  ;;  %v7216_v57 = vld [vmem:[#allocation53_spill] sm:$0xff] }
 0x246   :  { %4451 = vmatpush1.bf16.msra.mxu1 %v7210_v53  ;;  %4618 = vmatpush3.bf16.msra.mxu0 %v7211_v61  ;;  %v7236_v61 = vand.u32 4294901760, %v7156_v29  ;;  %v7241_v29 = vand.u32 4294901760, %v5860_v4  ;;  %v7248_v4 = vand.u32 4294901760, %v5897_v38  ;;  %v7254_v38 = vand.u32 4294901760, %v5928_v18 }
 0x247   :  { %4453 = vmatprep.subr.bf16.mxu1 %v7212_v44  ;;  %4619 = vmatprep.subr.bf16.mxu0 %v7162_v56  ;;  %v7221_v44 = vld [vmem:[#allocation21_spill] sm:$0xff]  ;;  %v7260_v18 = vand.u32 4294901760, %v7145_v35  ;;  %v7266_v35 = vand.u32 4294901760, %v5978_v49  ;;  %v7272_v49 = vand.u32 4294901760, %v7199_v21  ;;  %v7278_v21 = vand.u32 4294901760, %v6015_v17  ;;  %v7283_v17 = vld [vmem:[#allocation43_spill] sm:$0xff] }
 0x248   :  { %2235 = vmatprep.mubr.f32.mxu1 %v7163_v39  ;;  %3943 = vmatprep.mubr.msk.f32.mxu0 %vm4836_vm0, %v7163_v39 }
 0x24a   :  { %4455 = vmatpush1.bf16.msra.mxu1 %v7213_v5  ;;  %4621 = vmatpush3.bf16.msra.mxu0 %v7214_v32  ;;  %v7222_v32 = vld [vmem:[#allocation22_spill] sm:$0xff]  ;;  %v7224_v5 = vld [vmem:[#allocation24_spill] sm:$0xff] }
 0x24b   :  { %4457 = vmatprep.subr.bf16.mxu1 %v7215_v15  ;;  %4622 = vmatprep.subr.bf16.mxu0 %v7162_v56  ;;  %v7223_v15 = vld [vmem:[#allocation23_spill] sm:$0xff] }
 0x24e   :  { %4459 = vmatpush1.bf16.msra.mxu1 %v7216_v57  ;;  %4624 = vmatpush3.bf16.msra.mxu0 %v7217_v6  ;;  %v7225_v6 = vld [vmem:[#allocation25_spill] sm:$0xff]  ;;  %v7227_v57 = vld [vmem:[#allocation27_spill] sm:$0xff] }
 0x24f   :  { %4461 = vmatprep.subr.bf16.mxu1 %v7218_v31  ;;  %4625 = vmatprep.subr.bf16.mxu0 %v7162_v56  ;;  %v7226_v31 = vld [vmem:[#allocation26_spill] sm:$0xff] }
 0x252   :  { %4463 = vmatpush1.bf16.msra.mxu1 %v7219_v24  ;;  %4627 = vmatpush3.bf16.msra.mxu0 %v7220_v27  ;;  %v7228_v27 = vld [vmem:[#allocation30_spill] sm:$0xff]  ;;  %v7230_v24 = vld [vmem:[#allocation37_spill] sm:$0xff] }
 0x253   :  { %4465 = vmatprep.subr.bf16.mxu1 %v7221_v44  ;;  %4628 = vmatprep.subr.bf16.mxu0 %v7162_v56  ;;  %v7229_v44 = vld [vmem:[#allocation33_spill] sm:$0xff] }
 0x256   :  { %4467 = vmatpush1.bf16.msra.mxu1 %v7222_v32  ;;  %4630 = vmatpush3.bf16.msra.mxu0 %v7223_v15  ;;  %v7232_v15 = vand.u32 4294901760, %v5842_v54  ;;  %v7239_v54 = vand.u32 4294901760, %v7158_v60  ;;  %v7246_v60 = vand.u32 4294901760, %v5886_v43  ;;  %v7251_v43 = vand.u32 4294901760, %v5913_v7 }
 0x257   :  { %4469 = vmatprep.subr.bf16.mxu1 %v7224_v5  ;;  %4631 = vmatprep.subr.bf16.mxu0 %v7162_v56  ;;  %v7231_v5 = vand.u32 4294901760, %v5837_v42  ;;  %v7240_v42 = vand.u32 4294901760, %v5855_v63  ;;  %v7245_v63 = vand.u32 4294901760, %v5881_v20  ;;  %v7257_v7 = vand.u32 4294901760, %v5943_v11 }
 0x258   :  { %v7263_v11 = vand.u32 4294901760, %v5971_v41  ;;  %v7269_v41 = vand.u32 4294901760, %v5985_v48  ;;  %v7275_v48 = vand.u32 4294901760, %v7205_v58  ;;  %v7286_v58 = vld [vmem:[#allocation12_spill] sm:$0xff] }
 0x259   :  { %v4480_v32 = vpack.c.bf16 %v7232_v15, %v7231_v5  ;;  %v4484_v5 = vpack.c.bf16 %v7240_v42, %v7239_v54 }
 0x25a   :  { %4471 = vmatpush1.bf16.msra.mxu1 %v7225_v6  ;;  %4633 = vmatpush3.bf16.msra.mxu0 %v7226_v31  ;;  %v7233_v6 = vld [vmem:[#allocation42_spill] sm:$0xff]  ;;  %v7234_v31 = vld [vmem:[#allocation44_spill] sm:$0xff] }
 0x25b   :  { %4473 = vmatprep.subr.bf16.mxu1 %v7227_v57  ;;  %4634 = vmatprep.subr.bf16.mxu0 %v7162_v56  ;;  %v7235_v57 = vand.u32 4294901760, %v7155_v52 }
 0x25e   :  { %4475 = vmatpush1.bf16.msra.mxu1 %v7228_v27  ;;  %4636 = vmatpush3.bf16.msra.mxu0 %v7229_v44  ;;  %v4482_v27 = vpack.c.bf16 %v7236_v61, %v7235_v57  ;;  %v7237_v44 = vand.u32 4294901760, %v5662_v3  ;;  %v7242_v3 = vand.u32 4294901760, %v5865_v1  ;;  %v7244_v61 = vand.u32 4294901760, %v5876_v26 }
 0x25f   :  { %4477 = vmatprep.subr.bf16.mxu1 %v7230_v24  ;;  %4637 = vmatprep.subr.bf16.mxu0 %v7162_v56  ;;  %v7238_v24 = vand.u32 4294901760, %v7157_v34  ;;  %v7243_v34 = vand.u32 4294901760, %v5871_v37  ;;  %v7247_v1 = vand.u32 4294901760, %v5892_v25  ;;  %v7249_v26 = vand.u32 4294901760, %v5902_v36 }
 0x260   :  { %v4486_v52 = vpack.c.bf16 %v7242_v3, %v7241_v29  ;;  %v7253_v25 = vand.u32 4294901760, %v5923_v12  ;;  %v7255_v36 = vand.u32 4294901760, %v5933_v59  ;;  %v7259_v12 = vand.u32 4294901760, %v5953_v13 }
 0x261   :  { %v4641_v53 = vpack.c.bf16 %v7238_v24, %v7237_v44  ;;  %v4644_v44 = vpack.c.bf16 %v7244_v61, %v7243_v34  ;;  %v4490_v37 = vpack.c.bf16 %v7248_v4, %v7247_v1  ;;  %v7261_v59 = vand.u32 4294901760, %v5963_v50  ;;  %v7289_v1 = vld [vmem:[#allocation16_spill] sm:$0xff]  ;;  %v7290_v4 = vld [vmem:[#allocation18_spill] sm:$0xff] }
 0x262   :  { %4479 = vmatpush1.bf16.msra.mxu1 %v7233_v6  ;;  %4639 = vmatpush3.bf16.msra.mxu0 %v7234_v31  ;;  %v4494_v57 = vpack.c.bf16 %v7254_v38, %v7253_v25  ;;  %v4498_v54 = vpack.c.bf16 %v7260_v18, %v7259_v12  ;;  %v7265_v13 = vand.u32 4294901760, %v5976_v45  ;;  %v7267_v50 = vand.u32 4294901760, %v5981_v46  ;;  %v7299_v25 = vld [vmem:[#allocation30_spill] sm:$0xff]  ;;  %v7300_v38 = vld [vmem:[#allocation33_spill] sm:$0xff] }
 0x263   :  { %4481 = vmatprep.subr.bf16.mxu1 %v4480_v32  ;;  %4640 = vmatprep.subr.bf16.mxu0 %v7162_v56  ;;  %v7252_v32 = vand.u32 4294901760, %v5918_v30  ;;  %v7258_v30 = vand.u32 4294901760, %v5948_v47  ;;  %v7264_v47 = vand.u32 4294901760, %v5974_v9  ;;  %v7270_v9 = vand.u32 4294901760, %v5987_v55  ;;  %v4733_v18 = vld [vmem:[#allocation2] sm:$0xff] }
 0x264   :  { %v4502_v29 = vpack.c.bf16 %v7266_v35, %v7265_v13  ;;  %v7271_v45 = vand.u32 4294901760, %v7200_v14  ;;  %v7273_v46 = vand.u32 4294901760, %v7203_v8  ;;  %v7276_v55 = vand.u32 4294901760, %v6007_v23  ;;  %v7281_v23 = vld [vmem:[#allocation14_spill] sm:$0xff] }
 0x265   :  { %2239 = vmatmul.mubr.f32.vlgmr.msra.gmra.mrb[12].mxu1 %v6325_v33  ;;  %3944 = vmatmul.mubr.f32.vlgmr.msra.gmra.mrb[2].mxu0 %v6325_v33  ;;  %v4488_v33 = vpack.c.bf16 %v7246_v60, %v7245_v63  ;;  %v4492_v15 = vpack.c.bf16 %v7252_v32, %v7251_v43  ;;  %v7277_v14 = vand.u32 4294901760, %v6013_v10  ;;  %v7279_v8 = vand.u32 4294901760, %v6020_v22  ;;  %v7282_v10 = vld [vmem:[#allocation15_spill] sm:$0xff]  ;;  %v7284_v22 = vld [vmem:[#allocation45_spill] sm:$0xff]  ;;  %v7297_v32 = vld [vmem:[#allocation26_spill] sm:$0xff] }
 0x266   :  { %4483 = vmatpush1.bf16.msra.mxu1 %v4482_v27  ;;  %4642 = vmatpush3.bf16.msra.mxu0 %v4641_v53  ;;  %v7250_v53 = vand.u32 4294901760, %v5907_v62  ;;  %v7256_v62 = vand.u32 4294901760, %v5938_v16  ;;  %v4496_v27 = vpack.c.bf16 %v7258_v30, %v7257_v7  ;;  %v7262_v16 = vand.u32 4294901760, %v5968_v28  ;;  %v7296_v43 = vld [vmem:[#allocation25_spill] sm:$0xff] }
 0x267   :  { %4485 = vmatprep.subr.bf16.mxu1 %v4484_v5  ;;  %4643 = vmatprep.subr.bf16.mxu0 %v7162_v56  ;;  %v4500_v5 = vpack.c.bf16 %v7264_v47, %v7263_v11  ;;  %v7268_v28 = vand.u32 4294901760, %v5983_v40  ;;  %v4506_v34 = vpack.c.bf16 %v7272_v49, %v7271_v45  ;;  %v7274_v40 = vand.u32 4294901760, %v7202_v0 }
 0x268   :  { %2405 = vmatprep.mubr.f32.mxu1 %v7163_v39  ;;  %3978 = vmatprep.mubr.msk.f32.mxu0 %vm4836_vm0, %v7163_v39  ;;  %v4647_v20 = vpack.c.bf16 %v7250_v53, %v7249_v26  ;;  %v4650_v24 = vpack.c.bf16 %v7256_v62, %v7255_v36  ;;  %v4653_v42 = vpack.c.bf16 %v7262_v16, %v7261_v59  ;;  %v7280_v0 = vand.u32 4294901760, %v6022_v2  ;;  %v7285_v2 = vld [vmem:[#allocation46_spill] sm:$0xff]  ;;  %v7294_v53 = vld [vmem:[#allocation23_spill] sm:$0xff] }
 0x269   :  { %v4656_v3 = vpack.c.bf16 %v7268_v28, %v7267_v50  ;;  %v4659_v61 = vpack.c.bf16 %v7274_v40, %v7273_v46  ;;  %v4510_v63 = vpack.c.bf16 %v7278_v21, %v7277_v14  ;;  %v7293_v26 = vld [vmem:[#allocation22_spill] sm:$0xff] }
 0x26a   :  { %4487 = vmatpush1.bf16.msra.mxu1 %v4486_v52  ;;  %4645 = vmatpush3.bf16.msra.mxu0 %v4644_v44  ;;  %v4504_v52 = vpack.c.bf16 %v7270_v9, %v7269_v41  ;;  %v4508_v44 = vpack.c.bf16 %v7276_v55, %v7275_v48  ;;  %v4662_v60 = vpack.c.bf16 %v7280_v0, %v7279_v8 }
 0x26b   :  { %4489 = vmatprep.subr.bf16.mxu1 %v4488_v33  ;;  %4646 = vmatprep.subr.bf16.mxu0 %v7162_v56  ;;  %v7288_v33 = vld [vmem:[#allocation50_spill] sm:$0xff] }
 0x26e   :  { %4491 = vmatpush1.bf16.msra.mxu1 %v4490_v37  ;;  %4648 = vmatpush3.bf16.msra.mxu0 %v4647_v20  ;;  %v7291_v37 = vld [vmem:[#allocation20_spill] sm:$0xff] }
 0x26f   :  { %4493 = vmatprep.subr.bf16.mxu1 %v4492_v15  ;;  %4649 = vmatprep.subr.bf16.mxu0 %v7162_v56  ;;  %v7295_v20 = vld [vmem:[#allocation24_spill] sm:$0xff]  ;;  %v7298_v15 = vld [vmem:[#allocation27_spill] sm:$0xff] }
 0x272   :  { %4495 = vmatpush1.bf16.msra.mxu1 %v4494_v57  ;;  %4651 = vmatpush3.bf16.msra.mxu0 %v4650_v24  ;;  %v7301_v57 = vld [vmem:[#allocation37_spill] sm:$0xff]  ;;  %v4732_v24 = vld [vmem:[#allocation2 + $0x8] sm:$0xf] }
 0x273   :  { %4497 = vmatprep.subr.bf16.mxu1 %v4496_v27  ;;  %4652 = vmatprep.subr.bf16.mxu0 %v7162_v56 }
 0x276   :  { %4499 = vmatpush1.bf16.msra.mxu1 %v4498_v54  ;;  %4654 = vmatpush3.bf16.msra.mxu0 %v4653_v42 }
 0x277   :  { %4501 = vmatprep.subr.bf16.mxu1 %v4500_v5  ;;  %4655 = vmatprep.subr.bf16.mxu0 %v7162_v56 }
 0x27a   :  { %4503 = vmatpush1.bf16.msra.mxu1 %v4502_v29  ;;  %4657 = vmatpush3.bf16.msra.mxu0 %v4656_v3 }
 0x27b   :  { %4505 = vmatprep.subr.bf16.mxu1 %v4504_v52  ;;  %4658 = vmatprep.subr.bf16.mxu0 %v7162_v56 }
 0x27e   :  { %4507 = vmatpush1.bf16.msra.mxu1 %v4506_v34  ;;  %4660 = vmatpush3.bf16.msra.mxu0 %v4659_v61 }
 0x27f   :  { %4509 = vmatprep.subr.bf16.mxu1 %v4508_v44  ;;  %4661 = vmatprep.subr.bf16.mxu0 %v7162_v56 }
 0x282   :  { %4511 = vmatpush1.bf16.msra.mxu1 %v4510_v63  ;;  %4663 = vmatpush3.bf16.msra.mxu0 %v4662_v60 }
 0x283   :  { %4513 = vmatprep.subr.bf16.mxu1 %v7209_v19  ;;  %4664 = vmatprep.subr.bf16.mxu0 %v7162_v56  ;;  %v7287_v19 = vld [vmem:[#allocation53_spill] sm:$0xff] }
 0x285   :  { %2407 = vmatmul.mubr.f32.vlgmr.msra.gmra.mrb[12].mxu1 %v6319_v51  ;;  %3979 = vmatmul.mubr.f32.vlgmr.msra.gmra.mrb[2].mxu0 %v6319_v51 }
 0x286   :  { %4515 = vmatpush1.bf16.msra.mxu1 %v7281_v23  ;;  %4666 = vmatpush3.bf16.msra.mxu0 %v7282_v10 }
 0x287   :  { %4517 = vmatprep.subr.bf16.mxu1 %v7283_v17  ;;  %4667 = vmatprep.subr.bf16.mxu0 %v7162_v56 }
 0x288   :  { %2509 = vmatprep.mubr.f32.mxu1 %v7163_v39  ;;  %4013 = vmatprep.mubr.msk.f32.mxu0 %vm4836_vm0, %v7163_v39  ;;  %v7292_v39 = vld [vmem:[#allocation21_spill] sm:$0xff] }
 0x28a   :  { %4519 = vmatpush1.bf16.msra.mxu1 %v7284_v22  ;;  %4669 = vmatpush3.bf16.msra.mxu0 %v7285_v2 }
 0x28b   :  { %4521 = vmatprep.subr.bf16.mxu1 %v7286_v58  ;;  %4670 = vmatprep.subr.bf16.mxu0 %v7162_v56 }
 0x28e   :  { %4523 = vmatpush1.bf16.msra.mxu1 %v7287_v19  ;;  %4672 = vmatpush3.bf16.msra.mxu0 %v7288_v33 }
 0x28f   :  { %4525 = vmatprep.subr.bf16.mxu1 %v7289_v1  ;;  %4673 = vmatprep.subr.bf16.mxu0 %v7162_v56 }
 0x292   :  { %4527 = vmatpush1.bf16.msra.mxu1 %v7290_v4  ;;  %4675 = vmatpush3.bf16.msra.mxu0 %v7291_v37 }
 0x293   :  { %4529 = vmatprep.subr.bf16.mxu1 %v7292_v39  ;;  %4676 = vmatprep.subr.bf16.mxu0 %v7162_v56 }
 0x296   :  { %4531 = vmatpush1.bf16.msra.mxu1 %v7293_v26  ;;  %4678 = vmatpush3.bf16.msra.mxu0 %v7294_v53 }
 0x297   :  { %4533 = vmatprep.subr.bf16.mxu1 %v7295_v20  ;;  %4679 = vmatprep.subr.bf16.mxu0 %v7162_v56 }
 0x29a   :  { %4535 = vmatpush1.bf16.msra.mxu1 %v7296_v43  ;;  %4681 = vmatpush3.bf16.msra.mxu0 %v7297_v32 }
 0x29b   :  { %4537 = vmatprep.subr.bf16.mxu1 %v7298_v15  ;;  %4682 = vmatprep.subr.bf16.mxu0 %v7162_v56 }
 0x29e   :  { %4539 = vmatpush1.bf16.msra.mxu1 %v7299_v25  ;;  %4684 = vmatpush3.bf16.msra.mxu0 %v7300_v38 }
 0x29f   :  { %4541 = vmatprep.subr.bf16.mxu1 %v7301_v57  ;;  %4685 = vmatprep.subr.bf16.mxu0 %v7162_v56 }
 0x2a2   :  { %4543 = vmatpush1.bf16.msra.mxu1 %v7233_v6  ;;  %4687 = vmatpush3.bf16.msra.mxu0 %v7234_v31 }
 0x2a5   :  { %2511 = vmatmul.mubr.f32.vlgmr.msra.gmra.mrb[12].mxu1 %v6319_v51  ;;  %4014 = vmatmul.mubr.f32.vlgmr.msra.gmra.mrb[2].mxu0 %v6319_v51 }
 0x378   :  { %v2512_v36 = vpop.f32.mrb[12].mxu1  ;;  %v3154_v62 = vpop.f32.mrb[2].mxu0 }
 0x379   :  { %v3163_v7 = vmul.f32 %v4732_v24, %v3154_v62  ;;  %v2514_v30 = vpop.f32.mrb[13].mxu1  ;;  %v4015_v27 = vpop.f32.mrb[3].mxu0 }
 0x37a   :  { %v3160_v12 = vcombine.low %v2512_v36, %v2514_v30 }
 0x37b   :  { %3165 = vst [vmem:[#allocation8 + $0x8] sm:$0xf] %v3163_v7 }
 0x37c   :  { %v3162_v56 = vmul.f32 %v4733_v18, %v3160_v12 }
 0x37e   :  { %3164 = vst [vmem:[#allocation8] sm:$0xff] %v3162_v56 }
 0x37f   :  { %4811 = shalt.err (!%p4808_p0)
}
 0x380   :  { %s4812_s27 = scalar_lea.hbm %s6647_s3, 192 }
 0x381   :  { %p4813_p1 = scmp.ne.s32.totalorder %s6647_s3, %s4812_s27  ;;  %p4816_p2 = scmp.lt.u32.totalorder %s4812_s27, %s6647_s3 }
 0x383   :  { %p4818_p3 = pnand %p4816_p2, %p4813_p1 }
 0x385   :  { %4821 = shalt.err (!%p4818_p3)
}
 0x386   :  { %3175 = dma.vmem_to_hbm [thread:$0]  %s3173_s23, 192, %s6647_s3, [#allocation4]  }
 0x387   :  { %4826 = dma.done.wait [#allocation4], 192  }
 0x388   :  { %4827 = vsyncadd [#allocation4], 4294967104 }
 0x389   :  { %3179 = vsyncpa [#allocation3], 1 }
 0x38a   :  { %3180 = vsyncpa [#allocation6], 1 }
 0x38b   :  { %3181 = vsyncpa [#allocation4], 1 }

</bundles_post_ra>
